<compile_context>
chip_gen: v7x
topology: tpu7x:2x2x1
jax: 0.10.0
libtpu: 0.0.40
codegen_flags: <defaults>
</compile_context>

<pallas_src>
import functools
import math

import jax
import jax.numpy as jnp
from jax.experimental import pallas as pl
from jax.experimental.pallas import tpu as pltpu

_VMEM_LIMIT = 32 * 1024 * 1024  # safe on v5e/v6e/v7x scoped VMEM


def _pick_tile(dim, target, align):
    """Largest multiple of `align` that divides `dim` and is <= `target`;
    falls back to the full dim (full-extent blocks are always legal)."""
    if dim <= target:
        return dim
    t = (min(target, dim) // align) * align
    while t >= align:
        if dim % t == 0:
            return t
        t -= align
    return dim


# ----------------------------------------------------------------------------
# Tiled linear (+bias, optional ReLU): y = act(x @ w + b)
# ----------------------------------------------------------------------------
def _linear_kernel(x_ref, w_ref, b_ref, o_ref, acc_ref, *, activation):
    @pl.when(pl.program_id(2) == 0)
    def _():
        acc_ref[...] = jnp.zeros_like(acc_ref)

    acc_ref[...] += jnp.dot(
        x_ref[...].astype(jnp.bfloat16),
        w_ref[...].astype(jnp.bfloat16),
        preferred_element_type=jnp.float32)

    @pl.when(pl.program_id(2) == pl.num_programs(2) - 1)
    def _():
        y = acc_ref[...] + b_ref[...]
        if activation == "relu":
            y = jnp.maximum(y, 0.0)
        o_ref[...] = y.astype(o_ref.dtype)


def pallas_linear(x, w, b, activation=None, *, tm=256, tn=256, tk=512):
    """x: (M, K), w: (K, N), b: (N,) -> (M, N) float32."""
    M, K = x.shape
    N = w.shape[1]
    tm = _pick_tile(M, tm, 8)
    tn = _pick_tile(N, tn, 128)
    tk = _pick_tile(K, tk, 128)
    kern = functools.partial(_linear_kernel, activation=activation)
    return pl.pallas_call(
        kern,
        out_shape=jax.ShapeDtypeStruct((M, N), jnp.float32),
        grid=(M // tm, N // tn, K // tk),
        in_specs=[
            pl.BlockSpec((tm, tk), lambda i, j, k: (i, k)),
            pl.BlockSpec((tk, tn), lambda i, j, k: (k, j)),
            pl.BlockSpec((1, tn), lambda i, j, k: (0, j)),
        ],
        out_specs=pl.BlockSpec((tm, tn), lambda i, j, k: (i, j)),
        scratch_shapes=[pltpu.VMEM((tm, tn), jnp.float32)],
        compiler_params=pltpu.CompilerParams(
            dimension_semantics=("parallel", "parallel", "arbitrary"),
            vmem_limit_bytes=_VMEM_LIMIT),
    )(x, w, b.reshape(1, N))


# ----------------------------------------------------------------------------
# Fused linear + residual add + LayerNorm:  LN(residual + x @ w + b)
# (full output dim resident so the LN reduction stays inside the kernel)
# ----------------------------------------------------------------------------
def _linear_res_ln_kernel(x_ref, w_ref, b_ref, r_ref, g_ref, bb_ref,
                          o_ref, acc_ref, *, eps):
    @pl.when(pl.program_id(1) == 0)
    def _():
        acc_ref[...] = jnp.zeros_like(acc_ref)

    acc_ref[...] += jnp.dot(
        x_ref[...].astype(jnp.bfloat16),
        w_ref[...].astype(jnp.bfloat16),
        preferred_element_type=jnp.float32)

    @pl.when(pl.program_id(1) == pl.num_programs(1) - 1)
    def _():
        y = acc_ref[...] + b_ref[...] + r_ref[...]
        mu = jnp.mean(y, axis=-1, keepdims=True)
        var = jnp.mean((y - mu) ** 2, axis=-1, keepdims=True)
        yn = (y - mu) * jax.lax.rsqrt(var + eps)
        o_ref[...] = (yn * g_ref[...] + bb_ref[...]).astype(o_ref.dtype)


def pallas_linear_residual_ln(x, w, b, residual, gamma, beta,
                              eps=1e-5, *, tm=256, tk=512):
    """x: (M, K), w: (K, N), residual: (M, N) -> LayerNorm(residual + x@w + b)."""
    M, K = x.shape
    N = w.shape[1]
    tm = _pick_tile(M, tm, 8)
    tk = _pick_tile(K, tk, 128)
    kern = functools.partial(_linear_res_ln_kernel, eps=eps)
    return pl.pallas_call(
        kern,
        out_shape=jax.ShapeDtypeStruct((M, N), jnp.float32),
        grid=(M // tm, K // tk),
        in_specs=[
            pl.BlockSpec((tm, tk), lambda i, k: (i, k)),
            pl.BlockSpec((tk, N), lambda i, k: (k, 0)),
            pl.BlockSpec((1, N), lambda i, k: (0, 0)),
            pl.BlockSpec((tm, N), lambda i, k: (i, 0)),
            pl.BlockSpec((1, N), lambda i, k: (0, 0)),
            pl.BlockSpec((1, N), lambda i, k: (0, 0)),
        ],
        out_specs=pl.BlockSpec((tm, N), lambda i, k: (i, 0)),
        scratch_shapes=[pltpu.VMEM((tm, N), jnp.float32)],
        compiler_params=pltpu.CompilerParams(
            dimension_semantics=("parallel", "arbitrary"),
            vmem_limit_bytes=_VMEM_LIMIT),
    )(x, w, b.reshape(1, N), residual, gamma.reshape(1, N), beta.reshape(1, N))


# ----------------------------------------------------------------------------
# Multi-head attention core: one grid step per batch element; q/k/v are static
# lane slices of the fused projection output, heads are a static in-kernel
# loop over lane slices (no XLU transposes, one lane-dense (T, D) store).
# ----------------------------------------------------------------------------
def _mha_heads(qf, kf, vf, m, nhead, scale):
    """qf: (Tq, D), kf/vf: (Tk, D), m: (1, Tk) additive mask -> (Tq, D) f32."""
    D = qf.shape[-1]
    dh = D // nhead
    qs = (qf * scale).astype(jnp.bfloat16)   # pre-scale q once (matches PyTorch)
    kb = kf.astype(jnp.bfloat16)
    vb = vf.astype(jnp.bfloat16)
    outs = []
    for h in range(nhead):                   # static unroll over heads
        q = qs[:, h * dh:(h + 1) * dh]       # (Tq, dh)
        k = kb[:, h * dh:(h + 1) * dh]       # (Tk, dh)
        v = vb[:, h * dh:(h + 1) * dh]       # (Tk, dh)
        # q @ k^T without materializing a transpose: contract dh of both.
        s = jax.lax.dot_general(
            q, k, dimension_numbers=(((1,), (1,)), ((), ())),
            preferred_element_type=jnp.float32)                # (Tq, Tk)
        s = s + m
        s = s - jnp.max(s, axis=-1, keepdims=True)
        e = jnp.exp(s)
        p = e * pl.reciprocal(jnp.sum(e, axis=-1, keepdims=True), approx=True)
        outs.append(jnp.dot(p.astype(jnp.bfloat16), v,
                            preferred_element_type=jnp.float32))  # (Tq, dh)
    # single lane-dense store of all heads
    return jnp.concatenate(outs, axis=-1)


def _self_attn_kernel(qkv_ref, m_ref, o_ref, *, nhead, scale):
    D = o_ref.shape[-1]
    qkv = qkv_ref[0]                          # (T, 3D) fused Q|K|V
    o_ref[0] = _mha_heads(qkv[:, :D], qkv[:, D:2 * D], qkv[:, 2 * D:],
                          m_ref[0], nhead, scale)


def _cross_attn_kernel(q_ref, kv_ref, m_ref, o_ref, *, nhead, scale):
    D = o_ref.shape[-1]
    kv = kv_ref[0]                            # (Tk, 2D) fused K|V
    o_ref[0] = _mha_heads(q_ref[0], kv[:, :D], kv[:, D:],
                          m_ref[0], nhead, scale)


# NOTE: the full (Tq, Tk) score matrix is materialized per head; for very long
# memory sequences this should become an online-softmax (flash) formulation
# with a Tk grid axis and VMEM accumulators.
def pallas_self_attention(qkv, mask_add, nhead):
    """qkv: (B, T, 3D) fused Q|K|V, mask_add: (B, 1, T) additive -> (B, T, D)."""
    B, T, D3 = qkv.shape
    D = D3 // 3
    scale = 1.0 / math.sqrt(D // nhead)
    kern = functools.partial(_self_attn_kernel, nhead=nhead, scale=scale)
    return pl.pallas_call(
        kern,
        out_shape=jax.ShapeDtypeStruct((B, T, D), jnp.float32),
        grid=(B,),
        in_specs=[
            pl.BlockSpec((1, T, D3), lambda b: (b, 0, 0)),
            pl.BlockSpec((1, 1, T), lambda b: (b, 0, 0)),
        ],
        out_specs=pl.BlockSpec((1, T, D), lambda b: (b, 0, 0)),
        compiler_params=pltpu.CompilerParams(
            dimension_semantics=("parallel",),
            vmem_limit_bytes=_VMEM_LIMIT),
    )(qkv, mask_add)


def pallas_cross_attention(q, kv, mask_add, nhead):
    """q: (B, Tq, D), kv: (B, Tk, 2D) fused K|V, mask_add: (B, 1, Tk)."""
    B, Tq, D = q.shape
    Tk = kv.shape[1]
    scale = 1.0 / math.sqrt(D // nhead)
    kern = functools.partial(_cross_attn_kernel, nhead=nhead, scale=scale)
    return pl.pallas_call(
        kern,
        out_shape=jax.ShapeDtypeStruct((B, Tq, D), jnp.float32),
        grid=(B,),
        in_specs=[
            pl.BlockSpec((1, Tq, D), lambda b: (b, 0, 0)),
            pl.BlockSpec((1, Tk, 2 * D), lambda b: (b, 0, 0)),
            pl.BlockSpec((1, 1, Tk), lambda b: (b, 0, 0)),
        ],
        out_specs=pl.BlockSpec((1, Tq, D), lambda b: (b, 0, 0)),
        compiler_params=pltpu.CompilerParams(
            dimension_semantics=("parallel",),
            vmem_limit_bytes=_VMEM_LIMIT),
    )(q, kv, mask_add)


# ----------------------------------------------------------------------------
# Model composition (glue in JAX, heavy math in the kernels above)
# ----------------------------------------------------------------------------
def self_attention_block(x, tgt_pad_add, p, ln_g, ln_b, nhead):
    B, T, D = x.shape
    x2 = x.reshape(B * T, D)
    qkv = pallas_linear(x2, p["wqkv"], p["bqkv"]).reshape(B, T, 3 * D)
    attn = pallas_self_attention(qkv, tgt_pad_add, nhead)           # (B, T, D)
    # out-projection + residual + LayerNorm fused in one kernel
    y = pallas_linear_residual_ln(attn.reshape(B * T, D), p["wo"], p["bo"],
                                  x2, ln_g, ln_b)
    return y.reshape(B, T, D)


def cross_attention_block(x, memory, mem_pad_add, p, ln_g, ln_b, nhead):
    B, Tq, D = x.shape
    Tk = memory.shape[1]
    x2 = x.reshape(B * Tq, D)
    q = pallas_linear(x2, p["wq"], p["bq"]).reshape(B, Tq, D)
    kv = pallas_linear(memory.reshape(B * Tk, D),
                       p["wkv"], p["bkv"]).reshape(B, Tk, 2 * D)    # fused K|V
    attn = pallas_cross_attention(q, kv, mem_pad_add, nhead)
    y = pallas_linear_residual_ln(attn.reshape(B * Tq, D), p["wo"], p["bo"],
                                  x2, ln_g, ln_b)
    return y.reshape(B, Tq, D)


def decoder_layer(x, memory, tgt_pad_add, mem_pad_add, lp, nhead):
    """Post-norm nn.TransformerDecoderLayer (activation=relu, dropout=identity)."""
    B, T, D = x.shape
    x = self_attention_block(x, tgt_pad_add, lp["self_attn"],
                             lp["ln1_g"], lp["ln1_b"], nhead)
    x = cross_attention_block(x, memory, mem_pad_add, lp["cross_attn"],
                              lp["ln2_g"], lp["ln2_b"], nhead)
    x2 = x.reshape(B * T, D)
    h = pallas_linear(x2, lp["w1"], lp["b1"], activation="relu")
    x = pallas_linear_residual_ln(h, lp["w2"], lp["b2"], x2,
                                  lp["ln3_g"], lp["ln3_b"]).reshape(B, T, D)
    return x


def ie_mask_transformer_forward(params, encoder_outputs, encoder_mask,
                                inp, inp_mask, inp_pos, inp_type, inp_if_hyp,
                                nhead):
    # Embedding-sum (gathers kept in JAX glue); dropout(eval) == identity.
    tgt = (params["embed"][inp]
           + params["pos_embed"][inp_pos]
           + params["type_embed"][inp_type]
           + params["if_hyp_embed"][inp_if_hyp]).astype(jnp.float32)
    # PyTorch: key_padding_mask = (1 - mask).bool(); True == padded -> -inf bias.
    B, S = encoder_mask.shape
    T = inp_mask.shape[1]
    mem_pad_add = jnp.where(encoder_mask > 0, 0.0, -1e9).astype(jnp.float32)
    mem_pad_add = mem_pad_add.reshape(B, 1, S)
    tgt_pad_add = jnp.where(inp_mask > 0, 0.0, -1e9).astype(jnp.float32)
    tgt_pad_add = tgt_pad_add.reshape(B, 1, T)

    x = tgt
    memory = encoder_outputs.astype(jnp.float32)
    for lp in params["layers"]:
        x = decoder_layer(x, memory, tgt_pad_add, mem_pad_add, lp, nhead)

    Bx, Tx, D = x.shape
    logits = pallas_linear(x.reshape(Bx * Tx, D),
                           params["w_vocab"], params["b_vocab"])
    return logits.reshape(Bx, Tx, -1)


# ----------------------------------------------------------------------------
# Deterministic parameter init (shapes from the module's __init__)
# ----------------------------------------------------------------------------
def init_params(key, vocab_size, decoder_size, embed_dim, nlayer):
    assert decoder_size == embed_dim
    D, V, FF = decoder_size, vocab_size, decoder_size * 4

    def normal(k, shape, scale=0.02):
        return (scale * jax.random.normal(k, shape)).astype(jnp.float32)

    keys = iter(jax.random.split(key, 8 + nlayer * 16))
    params = {
        "embed": normal(next(keys), (V, D)),
        "pos_embed": normal(next(keys), (200, D)),
        "type_embed": normal(next(keys), (500, D)),
        "if_hyp_embed": normal(next(keys), (2, D)),
        "w_vocab": normal(next(keys), (D, V)),
        "b_vocab": jnp.zeros((V,), jnp.float32),
        "layers": [],
    }

    for _ in range(nlayer):
        lp = {
            "self_attn": {
                "wqkv": normal(next(keys), (D, 3 * D)),        # fused Q|K|V
                "bqkv": jnp.zeros((3 * D,), jnp.float32),
                "wo": normal(next(keys), (D, D)),
                "bo": jnp.zeros((D,), jnp.float32),
            },
            "cross_attn": {
                "wq": normal(next(keys), (D, D)),
                "bq": jnp.zeros((D,), jnp.float32),
                "wkv": normal(next(keys), (D, 2 * D)),         # fused K|V
                "bkv": jnp.zeros((2 * D,), jnp.float32),
                "wo": normal(next(keys), (D, D)),
                "bo": jnp.zeros((D,), jnp.float32),
            },
            "w1": normal(next(keys), (D, FF)), "b1": jnp.zeros((FF,), jnp.float32),
            "w2": normal(next(keys), (FF, D)), "b2": jnp.zeros((D,), jnp.float32),
            "ln1_g": jnp.ones((D,), jnp.float32), "ln1_b": jnp.zeros((D,), jnp.float32),
            "ln2_g": jnp.ones((D,), jnp.float32), "ln2_b": jnp.zeros((D,), jnp.float32),
            "ln3_g": jnp.ones((D,), jnp.float32), "ln3_b": jnp.zeros((D,), jnp.float32),
        }
        params["layers"].append(lp)
    return params


# ----------------------------------------------------------------------------
if __name__ == "__main__":
    # Small config consistent with the module: encoder_size == decoder_size == embed_dim
    B, T, S = 2, 8, 8
    D, nhead, nlayer = 32, 4, 2
    vocab_size = 16

    root = jax.random.PRNGKey(0)
    k_param, k_enc, k_inp, k_pos, k_type, k_hyp = jax.random.split(root, 6)

    params = init_params(k_param, vocab_size, D, D, nlayer)

    encoder_outputs = jax.random.normal(k_enc, (B, S, D), jnp.float32)
    inp = jax.random.randint(k_inp, (B, T), 0, vocab_size)
    inp_pos = jnp.tile(jnp.arange(T, dtype=jnp.int32)[None, :], (B, 1))
    inp_type = jax.random.randint(k_type, (B, T), 0, 500)
    inp_if_hyp = jax.random.randint(k_hyp, (B, T), 0, 2)

    # mask convention: 1 == valid token, 0 == padded (module does (1 - mask).bool())
    encoder_mask = jnp.ones((B, S), jnp.int32).at[1, -2:].set(0)
    inp_mask = jnp.ones((B, T), jnp.int32).at[1, -1:].set(0)

    fwd = jax.jit(functools.partial(ie_mask_transformer_forward, nhead=nhead))
    logits = fwd(params, encoder_outputs, encoder_mask,
                 inp, inp_mask, inp_pos, inp_type, inp_if_hyp)
    jax.block_until_ready(logits)

    assert logits.shape == (B, T, vocab_size)
    assert bool(jnp.all(jnp.isfinite(logits)))
    print("KERNEL_OK")
</pallas_src>

<mosaic_0001>
module attributes {stable_mosaic.version = 11 : i64} {
  func.func @_self_attn_kernel(%arg0: i32, %arg1: memref<1x8x96xf32, #tpu.memory_space<vmem>>, %arg2: memref<1x1x8xf32, #tpu.memory_space<vmem>>, %arg3: memref<1x8x32xf32, #tpu.memory_space<vmem>>) attributes {dimension_semantics = [#tpu.dimension_semantics<parallel>], iteration_bounds = array<i64: 2>, scalar_prefetch = 0 : i64, scratch_operands = 0 : i64, tpu.core_type = #tpu.core_type<tc>, window_params = [{transform_indices = @transform_0, window_bounds = array<i64: 1, 8, 96>}, {transform_indices = @transform_1, window_bounds = array<i64: 1, 1, 8>}, {transform_indices = @transform_2, window_bounds = array<i64: 1, 8, 32>}]} {
    %c0 = arith.constant 0 : index
    %c0_0 = arith.constant 0 : index
    %c0_1 = arith.constant 0 : index
    %0 = vector.load %arg1[%c0, %c0_0, %c0_1] : memref<1x8x96xf32, #tpu.memory_space<vmem>>, vector<1x8x96xf32>
    %1 = vector.shape_cast %0 : vector<1x8x96xf32> to vector<8x96xf32>
    %2 = vector.extract_strided_slice %1 {offsets = [0, 0], sizes = [8, 32], strides = [1, 1]} : vector<8x96xf32> to vector<8x32xf32>
    %3 = vector.extract_strided_slice %1 {offsets = [0, 32], sizes = [8, 32], strides = [1, 1]} : vector<8x96xf32> to vector<8x32xf32>
    %4 = vector.extract_strided_slice %1 {offsets = [0, 64], sizes = [8, 32], strides = [1, 1]} : vector<8x96xf32> to vector<8x32xf32>
    %c0_2 = arith.constant 0 : index
    %c0_3 = arith.constant 0 : index
    %c0_4 = arith.constant 0 : index
    %5 = vector.load %arg2[%c0_2, %c0_3, %c0_4] : memref<1x1x8xf32, #tpu.memory_space<vmem>>, vector<1x1x8xf32>
    %6 = vector.shape_cast %5 : vector<1x1x8xf32> to vector<1x8xf32>
    %cst = arith.constant 0.353553385 : f32
    %7 = vector.broadcast %cst : f32 to vector<8x32xf32>
    %8 = arith.mulf %2, %7 : vector<8x32xf32>
    %9 = arith.truncf %8 : vector<8x32xf32> to vector<8x32xbf16>
    %10 = arith.truncf %3 : vector<8x32xf32> to vector<8x32xbf16>
    %11 = arith.truncf %4 : vector<8x32xf32> to vector<8x32xbf16>
    %12 = vector.extract_strided_slice %9 {offsets = [0, 0], sizes = [8, 8], strides = [1, 1]} : vector<8x32xbf16> to vector<8x8xbf16>
    %13 = vector.extract_strided_slice %10 {offsets = [0, 0], sizes = [8, 8], strides = [1, 1]} : vector<8x32xbf16> to vector<8x8xbf16>
    %14 = vector.extract_strided_slice %11 {offsets = [0, 0], sizes = [8, 8], strides = [1, 1]} : vector<8x32xbf16> to vector<8x8xbf16>
    %cst_5 = arith.constant dense<0.000000e+00> : vector<8x8xf32>
    %15 = tpu.matmul %12, %13, %cst_5 {dimension_numbers = #tpu.dot_dimension_numbers<[1], [1], [0], [0], [0, 0, 1, 0], [], []>} : vector<8x8xbf16>, vector<8x8xbf16>, vector<8x8xf32> -> vector<8x8xf32>
    %16 = vector.broadcast %6 : vector<1x8xf32> to vector<8x8xf32>
    %17 = arith.addf %15, %16 : vector<8x8xf32>
    %cst_6 = arith.constant dense<0xFF800000> : vector<8xf32>
    %18 = vector.multi_reduction <maximumf>, %17, %cst_6 [1] : vector<8x8xf32> to vector<8xf32>
    %19 = vector.shape_cast %18 : vector<8xf32> to vector<8x1xf32>
    %20 = vector.broadcast %19 : vector<8x1xf32> to vector<8x8xf32>
    %21 = arith.subf %17, %20 : vector<8x8xf32>
    %22 = math.exp %21 : vector<8x8xf32>
    %cst_7 = arith.constant dense<0.000000e+00> : vector<8xf32>
    %23 = vector.multi_reduction <add>, %22, %cst_7 [1] : vector<8x8xf32> to vector<8xf32>
    %24 = vector.shape_cast %23 : vector<8xf32> to vector<8x1xf32>
    %25 = tpu.reciprocal %24 {approx = true} : vector<8x1xf32> -> vector<8x1xf32>
    %26 = vector.broadcast %25 : vector<8x1xf32> to vector<8x8xf32>
    %27 = arith.mulf %22, %26 : vector<8x8xf32>
    %28 = arith.truncf %27 : vector<8x8xf32> to vector<8x8xbf16>
    %cst_8 = arith.constant dense<0.000000e+00> : vector<8x8xf32>
    %29 = tpu.matmul %28, %14, %cst_8 {dimension_numbers = #tpu.dot_dimension_numbers<[1], [0], [0], [1], [0, 0, 1, 1], [], []>} : vector<8x8xbf16>, vector<8x8xbf16>, vector<8x8xf32> -> vector<8x8xf32>
    %30 = vector.extract_strided_slice %9 {offsets = [0, 8], sizes = [8, 8], strides = [1, 1]} : vector<8x32xbf16> to vector<8x8xbf16>
    %31 = vector.extract_strided_slice %10 {offsets = [0, 8], sizes = [8, 8], strides = [1, 1]} : vector<8x32xbf16> to vector<8x8xbf16>
    %32 = vector.extract_strided_slice %11 {offsets = [0, 8], sizes = [8, 8], strides = [1, 1]} : vector<8x32xbf16> to vector<8x8xbf16>
    %cst_9 = arith.constant dense<0.000000e+00> : vector<8x8xf32>
    %33 = tpu.matmul %30, %31, %cst_9 {dimension_numbers = #tpu.dot_dimension_numbers<[1], [1], [0], [0], [0, 0, 1, 0], [], []>} : vector<8x8xbf16>, vector<8x8xbf16>, vector<8x8xf32> -> vector<8x8xf32>
    %34 = vector.broadcast %6 : vector<1x8xf32> to vector<8x8xf32>
    %35 = arith.addf %33, %34 : vector<8x8xf32>
    %cst_10 = arith.constant dense<0xFF800000> : vector<8xf32>
    %36 = vector.multi_reduction <maximumf>, %35, %cst_10 [1] : vector<8x8xf32> to vector<8xf32>
    %37 = vector.shape_cast %36 : vector<8xf32> to vector<8x1xf32>
    %38 = vector.broadcast %37 : vector<8x1xf32> to vector<8x8xf32>
    %39 = arith.subf %35, %38 : vector<8x8xf32>
    %40 = math.exp %39 : vector<8x8xf32>
    %cst_11 = arith.constant dense<0.000000e+00> : vector<8xf32>
    %41 = vector.multi_reduction <add>, %40, %cst_11 [1] : vector<8x8xf32> to vector<8xf32>
    %42 = vector.shape_cast %41 : vector<8xf32> to vector<8x1xf32>
    %43 = tpu.reciprocal %42 {approx = true} : vector<8x1xf32> -> vector<8x1xf32>
    %44 = vector.broadcast %43 : vector<8x1xf32> to vector<8x8xf32>
    %45 = arith.mulf %40, %44 : vector<8x8xf32>
    %46 = arith.truncf %45 : vector<8x8xf32> to vector<8x8xbf16>
    %cst_12 = arith.constant dense<0.000000e+00> : vector<8x8xf32>
    %47 = tpu.matmul %46, %32, %cst_12 {dimension_numbers = #tpu.dot_dimension_numbers<[1], [0], [0], [1], [0, 0, 1, 1], [], []>} : vector<8x8xbf16>, vector<8x8xbf16>, vector<8x8xf32> -> vector<8x8xf32>
    %48 = vector.extract_strided_slice %9 {offsets = [0, 16], sizes = [8, 8], strides = [1, 1]} : vector<8x32xbf16> to vector<8x8xbf16>
    %49 = vector.extract_strided_slice %10 {offsets = [0, 16], sizes = [8, 8], strides = [1, 1]} : vector<8x32xbf16> to vector<8x8xbf16>
    %50 = vector.extract_strided_slice %11 {offsets = [0, 16], sizes = [8, 8], strides = [1, 1]} : vector<8x32xbf16> to vector<8x8xbf16>
    %cst_13 = arith.constant dense<0.000000e+00> : vector<8x8xf32>
    %51 = tpu.matmul %48, %49, %cst_13 {dimension_numbers = #tpu.dot_dimension_numbers<[1], [1], [0], [0], [0, 0, 1, 0], [], []>} : vector<8x8xbf16>, vector<8x8xbf16>, vector<8x8xf32> -> vector<8x8xf32>
    %52 = vector.broadcast %6 : vector<1x8xf32> to vector<8x8xf32>
    %53 = arith.addf %51, %52 : vector<8x8xf32>
    %cst_14 = arith.constant dense<0xFF800000> : vector<8xf32>
    %54 = vector.multi_reduction <maximumf>, %53, %cst_14 [1] : vector<8x8xf32> to vector<8xf32>
    %55 = vector.shape_cast %54 : vector<8xf32> to vector<8x1xf32>
    %56 = vector.broadcast %55 : vector<8x1xf32> to vector<8x8xf32>
    %57 = arith.subf %53, %56 : vector<8x8xf32>
    %58 = math.exp %57 : vector<8x8xf32>
    %cst_15 = arith.constant dense<0.000000e+00> : vector<8xf32>
    %59 = vector.multi_reduction <add>, %58, %cst_15 [1] : vector<8x8xf32> to vector<8xf32>
    %60 = vector.shape_cast %59 : vector<8xf32> to vector<8x1xf32>
    %61 = tpu.reciprocal %60 {approx = true} : vector<8x1xf32> -> vector<8x1xf32>
    %62 = vector.broadcast %61 : vector<8x1xf32> to vector<8x8xf32>
    %63 = arith.mulf %58, %62 : vector<8x8xf32>
    %64 = arith.truncf %63 : vector<8x8xf32> to vector<8x8xbf16>
    %cst_16 = arith.constant dense<0.000000e+00> : vector<8x8xf32>
    %65 = tpu.matmul %64, %50, %cst_16 {dimension_numbers = #tpu.dot_dimension_numbers<[1], [0], [0], [1], [0, 0, 1, 1], [], []>} : vector<8x8xbf16>, vector<8x8xbf16>, vector<8x8xf32> -> vector<8x8xf32>
    %66 = vector.extract_strided_slice %9 {offsets = [0, 24], sizes = [8, 8], strides = [1, 1]} : vector<8x32xbf16> to vector<8x8xbf16>
    %67 = vector.extract_strided_slice %10 {offsets = [0, 24], sizes = [8, 8], strides = [1, 1]} : vector<8x32xbf16> to vector<8x8xbf16>
    %68 = vector.extract_strided_slice %11 {offsets = [0, 24], sizes = [8, 8], strides = [1, 1]} : vector<8x32xbf16> to vector<8x8xbf16>
    %cst_17 = arith.constant dense<0.000000e+00> : vector<8x8xf32>
    %69 = tpu.matmul %66, %67, %cst_17 {dimension_numbers = #tpu.dot_dimension_numbers<[1], [1], [0], [0], [0, 0, 1, 0], [], []>} : vector<8x8xbf16>, vector<8x8xbf16>, vector<8x8xf32> -> vector<8x8xf32>
    %70 = vector.broadcast %6 : vector<1x8xf32> to vector<8x8xf32>
    %71 = arith.addf %69, %70 : vector<8x8xf32>
    %cst_18 = arith.constant dense<0xFF800000> : vector<8xf32>
    %72 = vector.multi_reduction <maximumf>, %71, %cst_18 [1] : vector<8x8xf32> to vector<8xf32>
    %73 = vector.shape_cast %72 : vector<8xf32> to vector<8x1xf32>
    %74 = vector.broadcast %73 : vector<8x1xf32> to vector<8x8xf32>
    %75 = arith.subf %71, %74 : vector<8x8xf32>
    %76 = math.exp %75 : vector<8x8xf32>
    %cst_19 = arith.constant dense<0.000000e+00> : vector<8xf32>
    %77 = vector.multi_reduction <add>, %76, %cst_19 [1] : vector<8x8xf32> to vector<8xf32>
    %78 = vector.shape_cast %77 : vector<8xf32> to vector<8x1xf32>
    %79 = tpu.reciprocal %78 {approx = true} : vector<8x1xf32> -> vector<8x1xf32>
    %80 = vector.broadcast %79 : vector<8x1xf32> to vector<8x8xf32>
    %81 = arith.mulf %76, %80 : vector<8x8xf32>
    %82 = arith.truncf %81 : vector<8x8xf32> to vector<8x8xbf16>
    %cst_20 = arith.constant dense<0.000000e+00> : vector<8x8xf32>
    %83 = tpu.matmul %82, %68, %cst_20 {dimension_numbers = #tpu.dot_dimension_numbers<[1], [0], [0], [1], [0, 0, 1, 1], [], []>} : vector<8x8xbf16>, vector<8x8xbf16>, vector<8x8xf32> -> vector<8x8xf32>
    %84 = tpu.concatenate %29, %47, %65, %83 in 1 : vector<8x8xf32>, vector<8x8xf32>, vector<8x8xf32>, vector<8x8xf32> -> vector<8x32xf32>
    %c0_21 = arith.constant 0 : index
    %c0_22 = arith.constant 0 : index
    %c0_23 = arith.constant 0 : index
    %85 = vector.load %arg3[%c0_21, %c0_22, %c0_23] : memref<1x8x32xf32, #tpu.memory_space<vmem>>, vector<1x8x32xf32>
    %86 = vector.shape_cast %85 : vector<1x8x32xf32> to vector<8x32xf32>
    %87 = vector.shape_cast %84 : vector<8x32xf32> to vector<1x8x32xf32>
    tpu.vector_store %arg3[%c0_21, %c0_22, %c0_23], %87 {strides = array<i32>} : memref<1x8x32xf32, #tpu.memory_space<vmem>>, vector<1x8x32xf32>,
    return
  }
  func.func @transform_0(%arg0: i32) -> (i32, i32, i32) {
    %c0_i32 = arith.constant 0 : i32
    %c0_i32_0 = arith.constant 0 : i32
    %c0_i32_1 = arith.constant 0 : i32
    return %arg0, %c0_i32, %c0_i32_0 : i32, i32, i32
  }
  func.func @transform_1(%arg0: i32) -> (i32, i32, i32) {
    %c0_i32 = arith.constant 0 : i32
    %c0_i32_0 = arith.constant 0 : i32
    %c0_i32_1 = arith.constant 0 : i32
    return %arg0, %c0_i32, %c0_i32_0 : i32, i32, i32
  }
  func.func @transform_2(%arg0: i32) -> (i32, i32, i32) {
    %c0_i32 = arith.constant 0 : i32
    %c0_i32_0 = arith.constant 0 : i32
    %c0_i32_1 = arith.constant 0 : i32
    return %arg0, %c0_i32, %c0_i32_0 : i32, i32, i32
  }
}

module attributes {stable_mosaic.version = 11 : i64} {
  func.func @_linear_res_ln_kernel(%arg0: i32, %arg1: i32, %arg2: memref<16x32xf32, #tpu.memory_space<vmem>>, %arg3: memref<32x32xf32, #tpu.memory_space<vmem>>, %arg4: memref<1x32xf32, #tpu.memory_space<vmem>>, %arg5: memref<16x32xf32, #tpu.memory_space<vmem>>, %arg6: memref<1x32xf32, #tpu.memory_space<vmem>>, %arg7: memref<1x32xf32, #tpu.memory_space<vmem>>, %arg8: memref<16x32xf32, #tpu.memory_space<vmem>>, %arg9: memref<16x32xf32, #tpu.memory_space<vmem>>) attributes {dimension_semantics = [#tpu.dimension_semantics<parallel>, #tpu.dimension_semantics<arbitrary>], iteration_bounds = array<i64: 1, 1>, scalar_prefetch = 0 : i64, scratch_operands = 1 : i64, tpu.core_type = #tpu.core_type<tc>, window_params = [{transform_indices = @transform_0, window_bounds = array<i64: 16, 32>}, {transform_indices = @transform_1, window_bounds = array<i64: 32, 32>}, {pipeline_mode = #tpu.pipeline_mode<synchronous>, transform_indices = @transform_2, window_bounds = array<i64: 1, 32>}, {transform_indices = @transform_3, window_bounds = array<i64: 16, 32>}, {pipeline_mode = #tpu.pipeline_mode<synchronous>, transform_indices = @transform_4, window_bounds = array<i64: 1, 32>}, {pipeline_mode = #tpu.pipeline_mode<synchronous>, transform_indices = @transform_5, window_bounds = array<i64: 1, 32>}, {transform_indices = @transform_6, window_bounds = array<i64: 16, 32>}]} {
    %c0_i32 = arith.constant 0 : i32
    %0 = arith.cmpi eq, %arg1, %c0_i32 : i32
    %1 = arith.extui %0 : i1 to i32
    %c0_i32_0 = arith.constant 0 : i32
    %2 = arith.cmpi ne, %1, %c0_i32_0 : i32
    scf.if %2 {
      %cst_10 = arith.constant 0.000000e+00 : f32
      %14 = vector.broadcast %cst_10 : f32 to vector<16x32xf32>
      %c0_11 = arith.constant 0 : index
      %c0_12 = arith.constant 0 : index
      %15 = vector.load %arg9[%c0_11, %c0_12] : memref<16x32xf32, #tpu.memory_space<vmem>>, vector<16x32xf32>
      tpu.vector_store %arg9[%c0_11, %c0_12], %14 {strides = array<i32>} : memref<16x32xf32, #tpu.memory_space<vmem>>, vector<16x32xf32>,
    } else {
    }
    %c0 = arith.constant 0 : index
    %c0_1 = arith.constant 0 : index
    %3 = vector.load %arg9[%c0, %c0_1] : memref<16x32xf32, #tpu.memory_space<vmem>>, vector<16x32xf32>
    %c0_2 = arith.constant 0 : index
    %c0_3 = arith.constant 0 : index
    %4 = vector.load %arg2[%c0_2, %c0_3] : memref<16x32xf32, #tpu.memory_space<vmem>>, vector<16x32xf32>
    %5 = arith.truncf %4 : vector<16x32xf32> to vector<16x32xbf16>
    %c0_4 = arith.constant 0 : index
    %c0_5 = arith.constant 0 : index
    %6 = vector.load %arg3[%c0_4, %c0_5] : memref<32x32xf32, #tpu.memory_space<vmem>>, vector<32x32xf32>
    %7 = arith.truncf %6 : vector<32x32xf32> to vector<32x32xbf16>
    %cst = arith.constant dense<0.000000e+00> : vector<16x32xf32>
    %8 = tpu.matmul %5, %7, %cst {dimension_numbers = #tpu.dot_dimension_numbers<[1], [0], [0], [1], [0, 0, 1, 1], [], []>} : vector<16x32xbf16>, vector<32x32xbf16>, vector<16x32xf32> -> vector<16x32xf32>
    %9 = arith.addf %3, %8 : vector<16x32xf32>
    %c0_6 = arith.constant 0 : index
    %c0_7 = arith.constant 0 : index
    %10 = vector.load %arg9[%c0_6, %c0_7] : memref<16x32xf32, #tpu.memory_space<vmem>>, vector<16x32xf32>
    tpu.vector_store %arg9[%c0_6, %c0_7], %9 {strides = array<i32>} : memref<16x32xf32, #tpu.memory_space<vmem>>, vector<16x32xf32>,
    %c0_i32_8 = arith.constant 0 : i32
    %11 = arith.cmpi eq, %arg1, %c0_i32_8 : i32
    %12 = arith.extui %11 : i1 to i32
    %c0_i32_9 = arith.constant 0 : i32
    %13 = arith.cmpi ne, %12, %c0_i32_9 : i32
    scf.if %13 {
      %c0_10 = arith.constant 0 : index
      %c0_11 = arith.constant 0 : index
      %14 = vector.load %arg9[%c0_10, %c0_11] : memref<16x32xf32, #tpu.memory_space<vmem>>, vector<16x32xf32>
      %c0_12 = arith.constant 0 : index
      %c0_13 = arith.constant 0 : index
      %15 = vector.load %arg4[%c0_12, %c0_13] : memref<1x32xf32, #tpu.memory_space<vmem>>, vector<1x32xf32>
      %16 = vector.broadcast %15 : vector<1x32xf32> to vector<16x32xf32>
      %17 = arith.addf %14, %16 : vector<16x32xf32>
      %c0_14 = arith.constant 0 : index
      %c0_15 = arith.constant 0 : index
      %18 = vector.load %arg5[%c0_14, %c0_15] : memref<16x32xf32, #tpu.memory_space<vmem>>, vector<16x32xf32>
      %19 = arith.addf %17, %18 : vector<16x32xf32>
      %cst_16 = arith.constant dense<0.000000e+00> : vector<16xf32>
      %20 = vector.multi_reduction <add>, %19, %cst_16 [1] : vector<16x32xf32> to vector<16xf32>
      %21 = vector.shape_cast %20 : vector<16xf32> to vector<16x1xf32>
      %cst_17 = arith.constant 3.200000e+01 : f32
      %22 = vector.broadcast %cst_17 : f32 to vector<16x1xf32>
      %23 = arith.divf %21, %22 : vector<16x1xf32>
      %24 = vector.broadcast %23 : vector<16x1xf32> to vector<16x32xf32>
      %25 = arith.subf %19, %24 : vector<16x32xf32>
      %26 = arith.mulf %25, %25 : vector<16x32xf32>
      %cst_18 = arith.constant dense<0.000000e+00> : vector<16xf32>
      %27 = vector.multi_reduction <add>, %26, %cst_18 [1] : vector<16x32xf32> to vector<16xf32>
      %28 = vector.shape_cast %27 : vector<16xf32> to vector<16x1xf32>
      %cst_19 = arith.constant 3.200000e+01 : f32
      %29 = vector.broadcast %cst_19 : f32 to vector<16x1xf32>
      %30 = arith.divf %28, %29 : vector<16x1xf32>
      %31 = vector.broadcast %23 : vector<16x1xf32> to vector<16x32xf32>
      %32 = arith.subf %19, %31 : vector<16x32xf32>
      %cst_20 = arith.constant 9.99999974E-6 : f32
      %33 = vector.broadcast %cst_20 : f32 to vector<16x1xf32>
      %34 = arith.addf %30, %33 : vector<16x1xf32>
      %35 = math.rsqrt %34 : vector<16x1xf32>
      %36 = vector.broadcast %35 : vector<16x1xf32> to vector<16x32xf32>
      %37 = arith.mulf %32, %36 : vector<16x32xf32>
      %c0_21 = arith.constant 0 : index
      %c0_22 = arith.constant 0 : index
      %38 = vector.load %arg6[%c0_21, %c0_22] : memref<1x32xf32, #tpu.memory_space<vmem>>, vector<1x32xf32>
      %39 = vector.broadcast %38 : vector<1x32xf32> to vector<16x32xf32>
      %40 = arith.mulf %37, %39 : vector<16x32xf32>
      %c0_23 = arith.constant 0 : index
      %c0_24 = arith.constant 0 : index
      %41 = vector.load %arg7[%c0_23, %c0_24] : memref<1x32xf32, #tpu.memory_space<vmem>>, vector<1x32xf32>
      %42 = vector.broadcast %41 : vector<1x32xf32> to vector<16x32xf32>
      %43 = arith.addf %40, %42 : vector<16x32xf32>
      %c0_25 = arith.constant 0 : index
      %c0_26 = arith.constant 0 : index
      %44 = vector.load %arg8[%c0_25, %c0_26] : memref<16x32xf32, #tpu.memory_space<vmem>>, vector<16x32xf32>
      tpu.vector_store %arg8[%c0_25, %c0_26], %43 {strides = array<i32>} : memref<16x32xf32, #tpu.memory_space<vmem>>, vector<16x32xf32>,
    } else {
    }
    return
  }
  func.func @transform_0(%arg0: i32, %arg1: i32) -> (i32, i32) {
    %c0_i32 = arith.constant 0 : i32
    return %arg0, %arg1 : i32, i32
  }
  func.func @transform_1(%arg0: i32, %arg1: i32) -> (i32, i32) {
    %c0_i32 = arith.constant 0 : i32
    %c0_i32_0 = arith.constant 0 : i32
    return %arg1, %c0_i32 : i32, i32
  }
  func.func @transform_2(%arg0: i32, %arg1: i32) -> (i32, i32) {
    %c0_i32 = arith.constant 0 : i32
    %c0_i32_0 = arith.constant 0 : i32
    %c0_i32_1 = arith.constant 0 : i32
    return %c0_i32, %c0_i32_0 : i32, i32
  }
  func.func @transform_3(%arg0: i32, %arg1: i32) -> (i32, i32) {
    %c0_i32 = arith.constant 0 : i32
    %c0_i32_0 = arith.constant 0 : i32
    return %arg0, %c0_i32 : i32, i32
  }
  func.func @transform_4(%arg0: i32, %arg1: i32) -> (i32, i32) {
    %c0_i32 = arith.constant 0 : i32
    %c0_i32_0 = arith.constant 0 : i32
    %c0_i32_1 = arith.constant 0 : i32
    return %c0_i32, %c0_i32_0 : i32, i32
  }
  func.func @transform_5(%arg0: i32, %arg1: i32) -> (i32, i32) {
    %c0_i32 = arith.constant 0 : i32
    %c0_i32_0 = arith.constant 0 : i32
    %c0_i32_1 = arith.constant 0 : i32
    return %c0_i32, %c0_i32_0 : i32, i32
  }
  func.func @transform_6(%arg0: i32, %arg1: i32) -> (i32, i32) {
    %c0_i32 = arith.constant 0 : i32
    %c0_i32_0 = arith.constant 0 : i32
    return %arg0, %c0_i32 : i32, i32
  }
}

module attributes {stable_mosaic.version = 11 : i64} {
  func.func @_linear_kernel(%arg0: i32, %arg1: i32, %arg2: i32, %arg3: memref<16x32xf32, #tpu.memory_space<vmem>>, %arg4: memref<32x96xf32, #tpu.memory_space<vmem>>, %arg5: memref<1x96xf32, #tpu.memory_space<vmem>>, %arg6: memref<16x96xf32, #tpu.memory_space<vmem>>, %arg7: memref<16x96xf32, #tpu.memory_space<vmem>>) attributes {dimension_semantics = [#tpu.dimension_semantics<parallel>, #tpu.dimension_semantics<parallel>, #tpu.dimension_semantics<arbitrary>], iteration_bounds = array<i64: 1, 1, 1>, scalar_prefetch = 0 : i64, scratch_operands = 1 : i64, tpu.core_type = #tpu.core_type<tc>, window_params = [{transform_indices = @transform_0, window_bounds = array<i64: 16, 32>}, {transform_indices = @transform_1, window_bounds = array<i64: 32, 96>}, {transform_indices = @transform_2, window_bounds = array<i64: 1, 96>}, {transform_indices = @transform_3, window_bounds = array<i64: 16, 96>}]} {
    %c0_i32 = arith.constant 0 : i32
    %0 = arith.cmpi eq, %arg2, %c0_i32 : i32
    %1 = arith.extui %0 : i1 to i32
    %c0_i32_0 = arith.constant 0 : i32
    %2 = arith.cmpi ne, %1, %c0_i32_0 : i32
    scf.if %2 {
      %cst_10 = arith.constant 0.000000e+00 : f32
      %14 = vector.broadcast %cst_10 : f32 to vector<16x96xf32>
      %c0_11 = arith.constant 0 : index
      %c0_12 = arith.constant 0 : index
      %15 = vector.load %arg7[%c0_11, %c0_12] : memref<16x96xf32, #tpu.memory_space<vmem>>, vector<16x96xf32>
      tpu.vector_store %arg7[%c0_11, %c0_12], %14 {strides = array<i32>} : memref<16x96xf32, #tpu.memory_space<vmem>>, vector<16x96xf32>,
    } else {
    }
    %c0 = arith.constant 0 : index
    %c0_1 = arith.constant 0 : index
    %3 = vector.load %arg7[%c0, %c0_1] : memref<16x96xf32, #tpu.memory_space<vmem>>, vector<16x96xf32>
    %c0_2 = arith.constant 0 : index
    %c0_3 = arith.constant 0 : index
    %4 = vector.load %arg3[%c0_2, %c0_3] : memref<16x32xf32, #tpu.memory_space<vmem>>, vector<16x32xf32>
    %5 = arith.truncf %4 : vector<16x32xf32> to vector<16x32xbf16>
    %c0_4 = arith.constant 0 : index
    %c0_5 = arith.constant 0 : index
    %6 = vector.load %arg4[%c0_4, %c0_5] : memref<32x96xf32, #tpu.memory_space<vmem>>, vector<32x96xf32>
    %7 = arith.truncf %6 : vector<32x96xf32> to vector<32x96xbf16>
    %cst = arith.constant dense<0.000000e+00> : vector<16x96xf32>
    %8 = tpu.matmul %5, %7, %cst {dimension_numbers = #tpu.dot_dimension_numbers<[1], [0], [0], [1], [0, 0, 1, 1], [], []>} : vector<16x32xbf16>, vector<32x96xbf16>, vector<16x96xf32> -> vector<16x96xf32>
    %9 = arith.addf %3, %8 : vector<16x96xf32>
    %c0_6 = arith.constant 0 : index
    %c0_7 = arith.constant 0 : index
    %10 = vector.load %arg7[%c0_6, %c0_7] : memref<16x96xf32, #tpu.memory_space<vmem>>, vector<16x96xf32>
    tpu.vector_store %arg7[%c0_6, %c0_7], %9 {strides = array<i32>} : memref<16x96xf32, #tpu.memory_space<vmem>>, vector<16x96xf32>,
    %c0_i32_8 = arith.constant 0 : i32
    %11 = arith.cmpi eq, %arg2, %c0_i32_8 : i32
    %12 = arith.extui %11 : i1 to i32
    %c0_i32_9 = arith.constant 0 : i32
    %13 = arith.cmpi ne, %12, %c0_i32_9 : i32
    scf.if %13 {
      %c0_10 = arith.constant 0 : index
      %c0_11 = arith.constant 0 : index
      %14 = vector.load %arg7[%c0_10, %c0_11] : memref<16x96xf32, #tpu.memory_space<vmem>>, vector<16x96xf32>
      %c0_12 = arith.constant 0 : index
      %c0_13 = arith.constant 0 : index
      %15 = vector.load %arg5[%c0_12, %c0_13] : memref<1x96xf32, #tpu.memory_space<vmem>>, vector<1x96xf32>
      %16 = vector.broadcast %15 : vector<1x96xf32> to vector<16x96xf32>
      %17 = arith.addf %14, %16 : vector<16x96xf32>
      %c0_14 = arith.constant 0 : index
      %c0_15 = arith.constant 0 : index
      %18 = vector.load %arg6[%c0_14, %c0_15] : memref<16x96xf32, #tpu.memory_space<vmem>>, vector<16x96xf32>
      tpu.vector_store %arg6[%c0_14, %c0_15], %17 {strides = array<i32>} : memref<16x96xf32, #tpu.memory_space<vmem>>, vector<16x96xf32>,
    } else {
    }
    return
  }
  func.func @transform_0(%arg0: i32, %arg1: i32, %arg2: i32) -> (i32, i32) {
    %c0_i32 = arith.constant 0 : i32
    return %arg0, %arg2 : i32, i32
  }
  func.func @transform_1(%arg0: i32, %arg1: i32, %arg2: i32) -> (i32, i32) {
    %c0_i32 = arith.constant 0 : i32
    return %arg2, %arg1 : i32, i32
  }
  func.func @transform_2(%arg0: i32, %arg1: i32, %arg2: i32) -> (i32, i32) {
    %c0_i32 = arith.constant 0 : i32
    %c0_i32_0 = arith.constant 0 : i32
    return %c0_i32, %arg1 : i32, i32
  }
  func.func @transform_3(%arg0: i32, %arg1: i32, %arg2: i32) -> (i32, i32) {
    %c0_i32 = arith.constant 0 : i32
    return %arg0, %arg1 : i32, i32
  }
}

module attributes {stable_mosaic.version = 11 : i64} {
  func.func @_linear_kernel(%arg0: i32, %arg1: i32, %arg2: i32, %arg3: memref<16x32xf32, #tpu.memory_space<vmem>>, %arg4: memref<32x32xf32, #tpu.memory_space<vmem>>, %arg5: memref<1x32xf32, #tpu.memory_space<vmem>>, %arg6: memref<16x32xf32, #tpu.memory_space<vmem>>, %arg7: memref<16x32xf32, #tpu.memory_space<vmem>>) attributes {dimension_semantics = [#tpu.dimension_semantics<parallel>, #tpu.dimension_semantics<parallel>, #tpu.dimension_semantics<arbitrary>], iteration_bounds = array<i64: 1, 1, 1>, scalar_prefetch = 0 : i64, scratch_operands = 1 : i64, tpu.core_type = #tpu.core_type<tc>, window_params = [{transform_indices = @transform_0, window_bounds = array<i64: 16, 32>}, {transform_indices = @transform_1, window_bounds = array<i64: 32, 32>}, {transform_indices = @transform_2, window_bounds = array<i64: 1, 32>}, {transform_indices = @transform_3, window_bounds = array<i64: 16, 32>}]} {
    %c0_i32 = arith.constant 0 : i32
    %0 = arith.cmpi eq, %arg2, %c0_i32 : i32
    %1 = arith.extui %0 : i1 to i32
    %c0_i32_0 = arith.constant 0 : i32
    %2 = arith.cmpi ne, %1, %c0_i32_0 : i32
    scf.if %2 {
      %cst_10 = arith.constant 0.000000e+00 : f32
      %14 = vector.broadcast %cst_10 : f32 to vector<16x32xf32>
      %c0_11 = arith.constant 0 : index
      %c0_12 = arith.constant 0 : index
      %15 = vector.load %arg7[%c0_11, %c0_12] : memref<16x32xf32, #tpu.memory_space<vmem>>, vector<16x32xf32>
      tpu.vector_store %arg7[%c0_11, %c0_12], %14 {strides = array<i32>} : memref<16x32xf32, #tpu.memory_space<vmem>>, vector<16x32xf32>,
    } else {
    }
    %c0 = arith.constant 0 : index
    %c0_1 = arith.constant 0 : index
    %3 = vector.load %arg7[%c0, %c0_1] : memref<16x32xf32, #tpu.memory_space<vmem>>, vector<16x32xf32>
    %c0_2 = arith.constant 0 : index
    %c0_3 = arith.constant 0 : index
    %4 = vector.load %arg3[%c0_2, %c0_3] : memref<16x32xf32, #tpu.memory_space<vmem>>, vector<16x32xf32>
    %5 = arith.truncf %4 : vector<16x32xf32> to vector<16x32xbf16>
    %c0_4 = arith.constant 0 : index
    %c0_5 = arith.constant 0 : index
    %6 = vector.load %arg4[%c0_4, %c0_5] : memref<32x32xf32, #tpu.memory_space<vmem>>, vector<32x32xf32>
    %7 = arith.truncf %6 : vector<32x32xf32> to vector<32x32xbf16>
    %cst = arith.constant dense<0.000000e+00> : vector<16x32xf32>
    %8 = tpu.matmul %5, %7, %cst {dimension_numbers = #tpu.dot_dimension_numbers<[1], [0], [0], [1], [0, 0, 1, 1], [], []>} : vector<16x32xbf16>, vector<32x32xbf16>, vector<16x32xf32> -> vector<16x32xf32>
    %9 = arith.addf %3, %8 : vector<16x32xf32>
    %c0_6 = arith.constant 0 : index
    %c0_7 = arith.constant 0 : index
    %10 = vector.load %arg7[%c0_6, %c0_7] : memref<16x32xf32, #tpu.memory_space<vmem>>, vector<16x32xf32>
    tpu.vector_store %arg7[%c0_6, %c0_7], %9 {strides = array<i32>} : memref<16x32xf32, #tpu.memory_space<vmem>>, vector<16x32xf32>,
    %c0_i32_8 = arith.constant 0 : i32
    %11 = arith.cmpi eq, %arg2, %c0_i32_8 : i32
    %12 = arith.extui %11 : i1 to i32
    %c0_i32_9 = arith.constant 0 : i32
    %13 = arith.cmpi ne, %12, %c0_i32_9 : i32
    scf.if %13 {
      %c0_10 = arith.constant 0 : index
      %c0_11 = arith.constant 0 : index
      %14 = vector.load %arg7[%c0_10, %c0_11] : memref<16x32xf32, #tpu.memory_space<vmem>>, vector<16x32xf32>
      %c0_12 = arith.constant 0 : index
      %c0_13 = arith.constant 0 : index
      %15 = vector.load %arg5[%c0_12, %c0_13] : memref<1x32xf32, #tpu.memory_space<vmem>>, vector<1x32xf32>
      %16 = vector.broadcast %15 : vector<1x32xf32> to vector<16x32xf32>
      %17 = arith.addf %14, %16 : vector<16x32xf32>
      %c0_14 = arith.constant 0 : index
      %c0_15 = arith.constant 0 : index
      %18 = vector.load %arg6[%c0_14, %c0_15] : memref<16x32xf32, #tpu.memory_space<vmem>>, vector<16x32xf32>
      tpu.vector_store %arg6[%c0_14, %c0_15], %17 {strides = array<i32>} : memref<16x32xf32, #tpu.memory_space<vmem>>, vector<16x32xf32>,
    } else {
    }
    return
  }
  func.func @transform_0(%arg0: i32, %arg1: i32, %arg2: i32) -> (i32, i32) {
    %c0_i32 = arith.constant 0 : i32
    return %arg0, %arg2 : i32, i32
  }
  func.func @transform_1(%arg0: i32, %arg1: i32, %arg2: i32) -> (i32, i32) {
    %c0_i32 = arith.constant 0 : i32
    return %arg2, %arg1 : i32, i32
  }
  func.func @transform_2(%arg0: i32, %arg1: i32, %arg2: i32) -> (i32, i32) {
    %c0_i32 = arith.constant 0 : i32
    %c0_i32_0 = arith.constant 0 : i32
    return %c0_i32, %arg1 : i32, i32
  }
  func.func @transform_3(%arg0: i32, %arg1: i32, %arg2: i32) -> (i32, i32) {
    %c0_i32 = arith.constant 0 : i32
    return %arg0, %arg1 : i32, i32
  }
}

module attributes {stable_mosaic.version = 11 : i64} {
  func.func @_linear_kernel(%arg0: i32, %arg1: i32, %arg2: i32, %arg3: memref<16x32xf32, #tpu.memory_space<vmem>>, %arg4: memref<32x64xf32, #tpu.memory_space<vmem>>, %arg5: memref<1x64xf32, #tpu.memory_space<vmem>>, %arg6: memref<16x64xf32, #tpu.memory_space<vmem>>, %arg7: memref<16x64xf32, #tpu.memory_space<vmem>>) attributes {dimension_semantics = [#tpu.dimension_semantics<parallel>, #tpu.dimension_semantics<parallel>, #tpu.dimension_semantics<arbitrary>], iteration_bounds = array<i64: 1, 1, 1>, scalar_prefetch = 0 : i64, scratch_operands = 1 : i64, tpu.core_type = #tpu.core_type<tc>, window_params = [{transform_indices = @transform_0, window_bounds = array<i64: 16, 32>}, {transform_indices = @transform_1, window_bounds = array<i64: 32, 64>}, {transform_indices = @transform_2, window_bounds = array<i64: 1, 64>}, {transform_indices = @transform_3, window_bounds = array<i64: 16, 64>}]} {
    %c0_i32 = arith.constant 0 : i32
    %0 = arith.cmpi eq, %arg2, %c0_i32 : i32
    %1 = arith.extui %0 : i1 to i32
    %c0_i32_0 = arith.constant 0 : i32
    %2 = arith.cmpi ne, %1, %c0_i32_0 : i32
    scf.if %2 {
      %cst_10 = arith.constant 0.000000e+00 : f32
      %14 = vector.broadcast %cst_10 : f32 to vector<16x64xf32>
      %c0_11 = arith.constant 0 : index
      %c0_12 = arith.constant 0 : index
      %15 = vector.load %arg7[%c0_11, %c0_12] : memref<16x64xf32, #tpu.memory_space<vmem>>, vector<16x64xf32>
      tpu.vector_store %arg7[%c0_11, %c0_12], %14 {strides = array<i32>} : memref<16x64xf32, #tpu.memory_space<vmem>>, vector<16x64xf32>,
    } else {
    }
    %c0 = arith.constant 0 : index
    %c0_1 = arith.constant 0 : index
    %3 = vector.load %arg7[%c0, %c0_1] : memref<16x64xf32, #tpu.memory_space<vmem>>, vector<16x64xf32>
    %c0_2 = arith.constant 0 : index
    %c0_3 = arith.constant 0 : index
    %4 = vector.load %arg3[%c0_2, %c0_3] : memref<16x32xf32, #tpu.memory_space<vmem>>, vector<16x32xf32>
    %5 = arith.truncf %4 : vector<16x32xf32> to vector<16x32xbf16>
    %c0_4 = arith.constant 0 : index
    %c0_5 = arith.constant 0 : index
    %6 = vector.load %arg4[%c0_4, %c0_5] : memref<32x64xf32, #tpu.memory_space<vmem>>, vector<32x64xf32>
    %7 = arith.truncf %6 : vector<32x64xf32> to vector<32x64xbf16>
    %cst = arith.constant dense<0.000000e+00> : vector<16x64xf32>
    %8 = tpu.matmul %5, %7, %cst {dimension_numbers = #tpu.dot_dimension_numbers<[1], [0], [0], [1], [0, 0, 1, 1], [], []>} : vector<16x32xbf16>, vector<32x64xbf16>, vector<16x64xf32> -> vector<16x64xf32>
    %9 = arith.addf %3, %8 : vector<16x64xf32>
    %c0_6 = arith.constant 0 : index
    %c0_7 = arith.constant 0 : index
    %10 = vector.load %arg7[%c0_6, %c0_7] : memref<16x64xf32, #tpu.memory_space<vmem>>, vector<16x64xf32>
    tpu.vector_store %arg7[%c0_6, %c0_7], %9 {strides = array<i32>} : memref<16x64xf32, #tpu.memory_space<vmem>>, vector<16x64xf32>,
    %c0_i32_8 = arith.constant 0 : i32
    %11 = arith.cmpi eq, %arg2, %c0_i32_8 : i32
    %12 = arith.extui %11 : i1 to i32
    %c0_i32_9 = arith.constant 0 : i32
    %13 = arith.cmpi ne, %12, %c0_i32_9 : i32
    scf.if %13 {
      %c0_10 = arith.constant 0 : index
      %c0_11 = arith.constant 0 : index
      %14 = vector.load %arg7[%c0_10, %c0_11] : memref<16x64xf32, #tpu.memory_space<vmem>>, vector<16x64xf32>
      %c0_12 = arith.constant 0 : index
      %c0_13 = arith.constant 0 : index
      %15 = vector.load %arg5[%c0_12, %c0_13] : memref<1x64xf32, #tpu.memory_space<vmem>>, vector<1x64xf32>
      %16 = vector.broadcast %15 : vector<1x64xf32> to vector<16x64xf32>
      %17 = arith.addf %14, %16 : vector<16x64xf32>
      %c0_14 = arith.constant 0 : index
      %c0_15 = arith.constant 0 : index
      %18 = vector.load %arg6[%c0_14, %c0_15] : memref<16x64xf32, #tpu.memory_space<vmem>>, vector<16x64xf32>
      tpu.vector_store %arg6[%c0_14, %c0_15], %17 {strides = array<i32>} : memref<16x64xf32, #tpu.memory_space<vmem>>, vector<16x64xf32>,
    } else {
    }
    return
  }
  func.func @transform_0(%arg0: i32, %arg1: i32, %arg2: i32) -> (i32, i32) {
    %c0_i32 = arith.constant 0 : i32
    return %arg0, %arg2 : i32, i32
  }
  func.func @transform_1(%arg0: i32, %arg1: i32, %arg2: i32) -> (i32, i32) {
    %c0_i32 = arith.constant 0 : i32
    return %arg2, %arg1 : i32, i32
  }
  func.func @transform_2(%arg0: i32, %arg1: i32, %arg2: i32) -> (i32, i32) {
    %c0_i32 = arith.constant 0 : i32
    %c0_i32_0 = arith.constant 0 : i32
    return %c0_i32, %arg1 : i32, i32
  }
  func.func @transform_3(%arg0: i32, %arg1: i32, %arg2: i32) -> (i32, i32) {
    %c0_i32 = arith.constant 0 : i32
    return %arg0, %arg1 : i32, i32
  }
}

module attributes {stable_mosaic.version = 11 : i64} {
  func.func @_linear_kernel(%arg0: i32, %arg1: i32, %arg2: i32, %arg3: memref<16x32xf32, #tpu.memory_space<vmem>>, %arg4: memref<32x128xf32, #tpu.memory_space<vmem>>, %arg5: memref<1x128xf32, #tpu.memory_space<vmem>>, %arg6: memref<16x128xf32, #tpu.memory_space<vmem>>, %arg7: memref<16x128xf32, #tpu.memory_space<vmem>>) attributes {dimension_semantics = [#tpu.dimension_semantics<parallel>, #tpu.dimension_semantics<parallel>, #tpu.dimension_semantics<arbitrary>], iteration_bounds = array<i64: 1, 1, 1>, scalar_prefetch = 0 : i64, scratch_operands = 1 : i64, tpu.core_type = #tpu.core_type<tc>, window_params = [{transform_indices = @transform_0, window_bounds = array<i64: 16, 32>}, {transform_indices = @transform_1, window_bounds = array<i64: 32, 128>}, {transform_indices = @transform_2, window_bounds = array<i64: 1, 128>}, {transform_indices = @transform_3, window_bounds = array<i64: 16, 128>}]} {
    %c0_i32 = arith.constant 0 : i32
    %0 = arith.cmpi eq, %arg2, %c0_i32 : i32
    %1 = arith.extui %0 : i1 to i32
    %c0_i32_0 = arith.constant 0 : i32
    %2 = arith.cmpi ne, %1, %c0_i32_0 : i32
    scf.if %2 {
      %cst_10 = arith.constant 0.000000e+00 : f32
      %14 = vector.broadcast %cst_10 : f32 to vector<16x128xf32>
      %c0_11 = arith.constant 0 : index
      %c0_12 = arith.constant 0 : index
      %15 = vector.load %arg7[%c0_11, %c0_12] : memref<16x128xf32, #tpu.memory_space<vmem>>, vector<16x128xf32>
      tpu.vector_store %arg7[%c0_11, %c0_12], %14 {strides = array<i32>} : memref<16x128xf32, #tpu.memory_space<vmem>>, vector<16x128xf32>,
    } else {
    }
    %c0 = arith.constant 0 : index
    %c0_1 = arith.constant 0 : index
    %3 = vector.load %arg7[%c0, %c0_1] : memref<16x128xf32, #tpu.memory_space<vmem>>, vector<16x128xf32>
    %c0_2 = arith.constant 0 : index
    %c0_3 = arith.constant 0 : index
    %4 = vector.load %arg3[%c0_2, %c0_3] : memref<16x32xf32, #tpu.memory_space<vmem>>, vector<16x32xf32>
    %5 = arith.truncf %4 : vector<16x32xf32> to vector<16x32xbf16>
    %c0_4 = arith.constant 0 : index
    %c0_5 = arith.constant 0 : index
    %6 = vector.load %arg4[%c0_4, %c0_5] : memref<32x128xf32, #tpu.memory_space<vmem>>, vector<32x128xf32>
    %7 = arith.truncf %6 : vector<32x128xf32> to vector<32x128xbf16>
    %cst = arith.constant dense<0.000000e+00> : vector<16x128xf32>
    %8 = tpu.matmul %5, %7, %cst {dimension_numbers = #tpu.dot_dimension_numbers<[1], [0], [0], [1], [0, 0, 1, 1], [], []>} : vector<16x32xbf16>, vector<32x128xbf16>, vector<16x128xf32> -> vector<16x128xf32>
    %9 = arith.addf %3, %8 : vector<16x128xf32>
    %c0_6 = arith.constant 0 : index
    %c0_7 = arith.constant 0 : index
    %10 = vector.load %arg7[%c0_6, %c0_7] : memref<16x128xf32, #tpu.memory_space<vmem>>, vector<16x128xf32>
    tpu.vector_store %arg7[%c0_6, %c0_7], %9 {strides = array<i32>} : memref<16x128xf32, #tpu.memory_space<vmem>>, vector<16x128xf32>,
    %c0_i32_8 = arith.constant 0 : i32
    %11 = arith.cmpi eq, %arg2, %c0_i32_8 : i32
    %12 = arith.extui %11 : i1 to i32
    %c0_i32_9 = arith.constant 0 : i32
    %13 = arith.cmpi ne, %12, %c0_i32_9 : i32
    scf.if %13 {
      %c0_10 = arith.constant 0 : index
      %c0_11 = arith.constant 0 : index
      %14 = vector.load %arg7[%c0_10, %c0_11] : memref<16x128xf32, #tpu.memory_space<vmem>>, vector<16x128xf32>
      %c0_12 = arith.constant 0 : index
      %c0_13 = arith.constant 0 : index
      %15 = vector.load %arg5[%c0_12, %c0_13] : memref<1x128xf32, #tpu.memory_space<vmem>>, vector<1x128xf32>
      %16 = vector.broadcast %15 : vector<1x128xf32> to vector<16x128xf32>
      %17 = arith.addf %14, %16 : vector<16x128xf32>
      %cst_14 = arith.constant 0.000000e+00 : f32
      %18 = vector.broadcast %cst_14 : f32 to vector<16x128xf32>
      %19 = arith.maximumf %17, %18 : vector<16x128xf32>
      %c0_15 = arith.constant 0 : index
      %c0_16 = arith.constant 0 : index
      %20 = vector.load %arg6[%c0_15, %c0_16] : memref<16x128xf32, #tpu.memory_space<vmem>>, vector<16x128xf32>
      tpu.vector_store %arg6[%c0_15, %c0_16], %19 {strides = array<i32>} : memref<16x128xf32, #tpu.memory_space<vmem>>, vector<16x128xf32>,
    } else {
    }
    return
  }
  func.func @transform_0(%arg0: i32, %arg1: i32, %arg2: i32) -> (i32, i32) {
    %c0_i32 = arith.constant 0 : i32
    return %arg0, %arg2 : i32, i32
  }
  func.func @transform_1(%arg0: i32, %arg1: i32, %arg2: i32) -> (i32, i32) {
    %c0_i32 = arith.constant 0 : i32
    return %arg2, %arg1 : i32, i32
  }
  func.func @transform_2(%arg0: i32, %arg1: i32, %arg2: i32) -> (i32, i32) {
    %c0_i32 = arith.constant 0 : i32
    %c0_i32_0 = arith.constant 0 : i32
    return %c0_i32, %arg1 : i32, i32
  }
  func.func @transform_3(%arg0: i32, %arg1: i32, %arg2: i32) -> (i32, i32) {
    %c0_i32 = arith.constant 0 : i32
    return %arg0, %arg1 : i32, i32
  }
}

module attributes {stable_mosaic.version = 11 : i64} {
  func.func @_cross_attn_kernel(%arg0: i32, %arg1: memref<1x8x32xf32, #tpu.memory_space<vmem>>, %arg2: memref<1x8x64xf32, #tpu.memory_space<vmem>>, %arg3: memref<1x1x8xf32, #tpu.memory_space<vmem>>, %arg4: memref<1x8x32xf32, #tpu.memory_space<vmem>>) attributes {dimension_semantics = [#tpu.dimension_semantics<parallel>], iteration_bounds = array<i64: 2>, scalar_prefetch = 0 : i64, scratch_operands = 0 : i64, tpu.core_type = #tpu.core_type<tc>, window_params = [{transform_indices = @transform_0, window_bounds = array<i64: 1, 8, 32>}, {transform_indices = @transform_1, window_bounds = array<i64: 1, 8, 64>}, {transform_indices = @transform_2, window_bounds = array<i64: 1, 1, 8>}, {transform_indices = @transform_3, window_bounds = array<i64: 1, 8, 32>}]} {
    %c0 = arith.constant 0 : index
    %c0_0 = arith.constant 0 : index
    %c0_1 = arith.constant 0 : index
    %0 = vector.load %arg2[%c0, %c0_0, %c0_1] : memref<1x8x64xf32, #tpu.memory_space<vmem>>, vector<1x8x64xf32>
    %1 = vector.shape_cast %0 : vector<1x8x64xf32> to vector<8x64xf32>
    %c0_2 = arith.constant 0 : index
    %c0_3 = arith.constant 0 : index
    %c0_4 = arith.constant 0 : index
    %2 = vector.load %arg1[%c0_2, %c0_3, %c0_4] : memref<1x8x32xf32, #tpu.memory_space<vmem>>, vector<1x8x32xf32>
    %3 = vector.shape_cast %2 : vector<1x8x32xf32> to vector<8x32xf32>
    %4 = vector.extract_strided_slice %1 {offsets = [0, 0], sizes = [8, 32], strides = [1, 1]} : vector<8x64xf32> to vector<8x32xf32>
    %5 = vector.extract_strided_slice %1 {offsets = [0, 32], sizes = [8, 32], strides = [1, 1]} : vector<8x64xf32> to vector<8x32xf32>
    %c0_5 = arith.constant 0 : index
    %c0_6 = arith.constant 0 : index
    %c0_7 = arith.constant 0 : index
    %6 = vector.load %arg3[%c0_5, %c0_6, %c0_7] : memref<1x1x8xf32, #tpu.memory_space<vmem>>, vector<1x1x8xf32>
    %7 = vector.shape_cast %6 : vector<1x1x8xf32> to vector<1x8xf32>
    %cst = arith.constant 0.353553385 : f32
    %8 = vector.broadcast %cst : f32 to vector<8x32xf32>
    %9 = arith.mulf %3, %8 : vector<8x32xf32>
    %10 = arith.truncf %9 : vector<8x32xf32> to vector<8x32xbf16>
    %11 = arith.truncf %4 : vector<8x32xf32> to vector<8x32xbf16>
    %12 = arith.truncf %5 : vector<8x32xf32> to vector<8x32xbf16>
    %13 = vector.extract_strided_slice %10 {offsets = [0, 0], sizes = [8, 8], strides = [1, 1]} : vector<8x32xbf16> to vector<8x8xbf16>
    %14 = vector.extract_strided_slice %11 {offsets = [0, 0], sizes = [8, 8], strides = [1, 1]} : vector<8x32xbf16> to vector<8x8xbf16>
    %15 = vector.extract_strided_slice %12 {offsets = [0, 0], sizes = [8, 8], strides = [1, 1]} : vector<8x32xbf16> to vector<8x8xbf16>
    %cst_8 = arith.constant dense<0.000000e+00> : vector<8x8xf32>
    %16 = tpu.matmul %13, %14, %cst_8 {dimension_numbers = #tpu.dot_dimension_numbers<[1], [1], [0], [0], [0, 0, 1, 0], [], []>} : vector<8x8xbf16>, vector<8x8xbf16>, vector<8x8xf32> -> vector<8x8xf32>
    %17 = vector.broadcast %7 : vector<1x8xf32> to vector<8x8xf32>
    %18 = arith.addf %16, %17 : vector<8x8xf32>
    %cst_9 = arith.constant dense<0xFF800000> : vector<8xf32>
    %19 = vector.multi_reduction <maximumf>, %18, %cst_9 [1] : vector<8x8xf32> to vector<8xf32>
    %20 = vector.shape_cast %19 : vector<8xf32> to vector<8x1xf32>
    %21 = vector.broadcast %20 : vector<8x1xf32> to vector<8x8xf32>
    %22 = arith.subf %18, %21 : vector<8x8xf32>
    %23 = math.exp %22 : vector<8x8xf32>
    %cst_10 = arith.constant dense<0.000000e+00> : vector<8xf32>
    %24 = vector.multi_reduction <add>, %23, %cst_10 [1] : vector<8x8xf32> to vector<8xf32>
    %25 = vector.shape_cast %24 : vector<8xf32> to vector<8x1xf32>
    %26 = tpu.reciprocal %25 {approx = true} : vector<8x1xf32> -> vector<8x1xf32>
    %27 = vector.broadcast %26 : vector<8x1xf32> to vector<8x8xf32>
    %28 = arith.mulf %23, %27 : vector<8x8xf32>
    %29 = arith.truncf %28 : vector<8x8xf32> to vector<8x8xbf16>
    %cst_11 = arith.constant dense<0.000000e+00> : vector<8x8xf32>
    %30 = tpu.matmul %29, %15, %cst_11 {dimension_numbers = #tpu.dot_dimension_numbers<[1], [0], [0], [1], [0, 0, 1, 1], [], []>} : vector<8x8xbf16>, vector<8x8xbf16>, vector<8x8xf32> -> vector<8x8xf32>
    %31 = vector.extract_strided_slice %10 {offsets = [0, 8], sizes = [8, 8], strides = [1, 1]} : vector<8x32xbf16> to vector<8x8xbf16>
    %32 = vector.extract_strided_slice %11 {offsets = [0, 8], sizes = [8, 8], strides = [1, 1]} : vector<8x32xbf16> to vector<8x8xbf16>
    %33 = vector.extract_strided_slice %12 {offsets = [0, 8], sizes = [8, 8], strides = [1, 1]} : vector<8x32xbf16> to vector<8x8xbf16>
    %cst_12 = arith.constant dense<0.000000e+00> : vector<8x8xf32>
    %34 = tpu.matmul %31, %32, %cst_12 {dimension_numbers = #tpu.dot_dimension_numbers<[1], [1], [0], [0], [0, 0, 1, 0], [], []>} : vector<8x8xbf16>, vector<8x8xbf16>, vector<8x8xf32> -> vector<8x8xf32>
    %35 = vector.broadcast %7 : vector<1x8xf32> to vector<8x8xf32>
    %36 = arith.addf %34, %35 : vector<8x8xf32>
    %cst_13 = arith.constant dense<0xFF800000> : vector<8xf32>
    %37 = vector.multi_reduction <maximumf>, %36, %cst_13 [1] : vector<8x8xf32> to vector<8xf32>
    %38 = vector.shape_cast %37 : vector<8xf32> to vector<8x1xf32>
    %39 = vector.broadcast %38 : vector<8x1xf32> to vector<8x8xf32>
    %40 = arith.subf %36, %39 : vector<8x8xf32>
    %41 = math.exp %40 : vector<8x8xf32>
    %cst_14 = arith.constant dense<0.000000e+00> : vector<8xf32>
    %42 = vector.multi_reduction <add>, %41, %cst_14 [1] : vector<8x8xf32> to vector<8xf32>
    %43 = vector.shape_cast %42 : vector<8xf32> to vector<8x1xf32>
    %44 = tpu.reciprocal %43 {approx = true} : vector<8x1xf32> -> vector<8x1xf32>
    %45 = vector.broadcast %44 : vector<8x1xf32> to vector<8x8xf32>
    %46 = arith.mulf %41, %45 : vector<8x8xf32>
    %47 = arith.truncf %46 : vector<8x8xf32> to vector<8x8xbf16>
    %cst_15 = arith.constant dense<0.000000e+00> : vector<8x8xf32>
    %48 = tpu.matmul %47, %33, %cst_15 {dimension_numbers = #tpu.dot_dimension_numbers<[1], [0], [0], [1], [0, 0, 1, 1], [], []>} : vector<8x8xbf16>, vector<8x8xbf16>, vector<8x8xf32> -> vector<8x8xf32>
    %49 = vector.extract_strided_slice %10 {offsets = [0, 16], sizes = [8, 8], strides = [1, 1]} : vector<8x32xbf16> to vector<8x8xbf16>
    %50 = vector.extract_strided_slice %11 {offsets = [0, 16], sizes = [8, 8], strides = [1, 1]} : vector<8x32xbf16> to vector<8x8xbf16>
    %51 = vector.extract_strided_slice %12 {offsets = [0, 16], sizes = [8, 8], strides = [1, 1]} : vector<8x32xbf16> to vector<8x8xbf16>
    %cst_16 = arith.constant dense<0.000000e+00> : vector<8x8xf32>
    %52 = tpu.matmul %49, %50, %cst_16 {dimension_numbers = #tpu.dot_dimension_numbers<[1], [1], [0], [0], [0, 0, 1, 0], [], []>} : vector<8x8xbf16>, vector<8x8xbf16>, vector<8x8xf32> -> vector<8x8xf32>
    %53 = vector.broadcast %7 : vector<1x8xf32> to vector<8x8xf32>
    %54 = arith.addf %52, %53 : vector<8x8xf32>
    %cst_17 = arith.constant dense<0xFF800000> : vector<8xf32>
    %55 = vector.multi_reduction <maximumf>, %54, %cst_17 [1] : vector<8x8xf32> to vector<8xf32>
    %56 = vector.shape_cast %55 : vector<8xf32> to vector<8x1xf32>
    %57 = vector.broadcast %56 : vector<8x1xf32> to vector<8x8xf32>
    %58 = arith.subf %54, %57 : vector<8x8xf32>
    %59 = math.exp %58 : vector<8x8xf32>
    %cst_18 = arith.constant dense<0.000000e+00> : vector<8xf32>
    %60 = vector.multi_reduction <add>, %59, %cst_18 [1] : vector<8x8xf32> to vector<8xf32>
    %61 = vector.shape_cast %60 : vector<8xf32> to vector<8x1xf32>
    %62 = tpu.reciprocal %61 {approx = true} : vector<8x1xf32> -> vector<8x1xf32>
    %63 = vector.broadcast %62 : vector<8x1xf32> to vector<8x8xf32>
    %64 = arith.mulf %59, %63 : vector<8x8xf32>
    %65 = arith.truncf %64 : vector<8x8xf32> to vector<8x8xbf16>
    %cst_19 = arith.constant dense<0.000000e+00> : vector<8x8xf32>
    %66 = tpu.matmul %65, %51, %cst_19 {dimension_numbers = #tpu.dot_dimension_numbers<[1], [0], [0], [1], [0, 0, 1, 1], [], []>} : vector<8x8xbf16>, vector<8x8xbf16>, vector<8x8xf32> -> vector<8x8xf32>
    %67 = vector.extract_strided_slice %10 {offsets = [0, 24], sizes = [8, 8], strides = [1, 1]} : vector<8x32xbf16> to vector<8x8xbf16>
    %68 = vector.extract_strided_slice %11 {offsets = [0, 24], sizes = [8, 8], strides = [1, 1]} : vector<8x32xbf16> to vector<8x8xbf16>
    %69 = vector.extract_strided_slice %12 {offsets = [0, 24], sizes = [8, 8], strides = [1, 1]} : vector<8x32xbf16> to vector<8x8xbf16>
    %cst_20 = arith.constant dense<0.000000e+00> : vector<8x8xf32>
    %70 = tpu.matmul %67, %68, %cst_20 {dimension_numbers = #tpu.dot_dimension_numbers<[1], [1], [0], [0], [0, 0, 1, 0], [], []>} : vector<8x8xbf16>, vector<8x8xbf16>, vector<8x8xf32> -> vector<8x8xf32>
    %71 = vector.broadcast %7 : vector<1x8xf32> to vector<8x8xf32>
    %72 = arith.addf %70, %71 : vector<8x8xf32>
    %cst_21 = arith.constant dense<0xFF800000> : vector<8xf32>
    %73 = vector.multi_reduction <maximumf>, %72, %cst_21 [1] : vector<8x8xf32> to vector<8xf32>
    %74 = vector.shape_cast %73 : vector<8xf32> to vector<8x1xf32>
    %75 = vector.broadcast %74 : vector<8x1xf32> to vector<8x8xf32>
    %76 = arith.subf %72, %75 : vector<8x8xf32>
    %77 = math.exp %76 : vector<8x8xf32>
    %cst_22 = arith.constant dense<0.000000e+00> : vector<8xf32>
    %78 = vector.multi_reduction <add>, %77, %cst_22 [1] : vector<8x8xf32> to vector<8xf32>
    %79 = vector.shape_cast %78 : vector<8xf32> to vector<8x1xf32>
    %80 = tpu.reciprocal %79 {approx = true} : vector<8x1xf32> -> vector<8x1xf32>
    %81 = vector.broadcast %80 : vector<8x1xf32> to vector<8x8xf32>
    %82 = arith.mulf %77, %81 : vector<8x8xf32>
    %83 = arith.truncf %82 : vector<8x8xf32> to vector<8x8xbf16>
    %cst_23 = arith.constant dense<0.000000e+00> : vector<8x8xf32>
    %84 = tpu.matmul %83, %69, %cst_23 {dimension_numbers = #tpu.dot_dimension_numbers<[1], [0], [0], [1], [0, 0, 1, 1], [], []>} : vector<8x8xbf16>, vector<8x8xbf16>, vector<8x8xf32> -> vector<8x8xf32>
    %85 = tpu.concatenate %30, %48, %66, %84 in 1 : vector<8x8xf32>, vector<8x8xf32>, vector<8x8xf32>, vector<8x8xf32> -> vector<8x32xf32>
    %c0_24 = arith.constant 0 : index
    %c0_25 = arith.constant 0 : index
    %c0_26 = arith.constant 0 : index
    %86 = vector.load %arg4[%c0_24, %c0_25, %c0_26] : memref<1x8x32xf32, #tpu.memory_space<vmem>>, vector<1x8x32xf32>
    %87 = vector.shape_cast %86 : vector<1x8x32xf32> to vector<8x32xf32>
    %88 = vector.shape_cast %85 : vector<8x32xf32> to vector<1x8x32xf32>
    tpu.vector_store %arg4[%c0_24, %c0_25, %c0_26], %88 {strides = array<i32>} : memref<1x8x32xf32, #tpu.memory_space<vmem>>, vector<1x8x32xf32>,
    return
  }
  func.func @transform_0(%arg0: i32) -> (i32, i32, i32) {
    %c0_i32 = arith.constant 0 : i32
    %c0_i32_0 = arith.constant 0 : i32
    %c0_i32_1 = arith.constant 0 : i32
    return %arg0, %c0_i32, %c0_i32_0 : i32, i32, i32
  }
  func.func @transform_1(%arg0: i32) -> (i32, i32, i32) {
    %c0_i32 = arith.constant 0 : i32
    %c0_i32_0 = arith.constant 0 : i32
    %c0_i32_1 = arith.constant 0 : i32
    return %arg0, %c0_i32, %c0_i32_0 : i32, i32, i32
  }
  func.func @transform_2(%arg0: i32) -> (i32, i32, i32) {
    %c0_i32 = arith.constant 0 : i32
    %c0_i32_0 = arith.constant 0 : i32
    %c0_i32_1 = arith.constant 0 : i32
    return %arg0, %c0_i32, %c0_i32_0 : i32, i32, i32
  }
  func.func @transform_3(%arg0: i32) -> (i32, i32, i32) {
    %c0_i32 = arith.constant 0 : i32
    %c0_i32_0 = arith.constant 0 : i32
    %c0_i32_1 = arith.constant 0 : i32
    return %arg0, %c0_i32, %c0_i32_0 : i32, i32, i32
  }
}

module attributes {stable_mosaic.version = 11 : i64} {
  func.func @_linear_res_ln_kernel(%arg0: i32, %arg1: i32, %arg2: memref<16x128xf32, #tpu.memory_space<vmem>>, %arg3: memref<128x32xf32, #tpu.memory_space<vmem>>, %arg4: memref<1x32xf32, #tpu.memory_space<vmem>>, %arg5: memref<16x32xf32, #tpu.memory_space<vmem>>, %arg6: memref<1x32xf32, #tpu.memory_space<vmem>>, %arg7: memref<1x32xf32, #tpu.memory_space<vmem>>, %arg8: memref<16x32xf32, #tpu.memory_space<vmem>>, %arg9: memref<16x32xf32, #tpu.memory_space<vmem>>) attributes {dimension_semantics = [#tpu.dimension_semantics<parallel>, #tpu.dimension_semantics<arbitrary>], iteration_bounds = array<i64: 1, 1>, scalar_prefetch = 0 : i64, scratch_operands = 1 : i64, tpu.core_type = #tpu.core_type<tc>, window_params = [{transform_indices = @transform_0, window_bounds = array<i64: 16, 128>}, {transform_indices = @transform_1, window_bounds = array<i64: 128, 32>}, {pipeline_mode = #tpu.pipeline_mode<synchronous>, transform_indices = @transform_2, window_bounds = array<i64: 1, 32>}, {transform_indices = @transform_3, window_bounds = array<i64: 16, 32>}, {pipeline_mode = #tpu.pipeline_mode<synchronous>, transform_indices = @transform_4, window_bounds = array<i64: 1, 32>}, {pipeline_mode = #tpu.pipeline_mode<synchronous>, transform_indices = @transform_5, window_bounds = array<i64: 1, 32>}, {transform_indices = @transform_6, window_bounds = array<i64: 16, 32>}]} {
    %c0_i32 = arith.constant 0 : i32
    %0 = arith.cmpi eq, %arg1, %c0_i32 : i32
    %1 = arith.extui %0 : i1 to i32
    %c0_i32_0 = arith.constant 0 : i32
    %2 = arith.cmpi ne, %1, %c0_i32_0 : i32
    scf.if %2 {
      %cst_10 = arith.constant 0.000000e+00 : f32
      %14 = vector.broadcast %cst_10 : f32 to vector<16x32xf32>
      %c0_11 = arith.constant 0 : index
      %c0_12 = arith.constant 0 : index
      %15 = vector.load %arg9[%c0_11, %c0_12] : memref<16x32xf32, #tpu.memory_space<vmem>>, vector<16x32xf32>
      tpu.vector_store %arg9[%c0_11, %c0_12], %14 {strides = array<i32>} : memref<16x32xf32, #tpu.memory_space<vmem>>, vector<16x32xf32>,
    } else {
    }
    %c0 = arith.constant 0 : index
    %c0_1 = arith.constant 0 : index
    %3 = vector.load %arg9[%c0, %c0_1] : memref<16x32xf32, #tpu.memory_space<vmem>>, vector<16x32xf32>
    %c0_2 = arith.constant 0 : index
    %c0_3 = arith.constant 0 : index
    %4 = vector.load %arg2[%c0_2, %c0_3] : memref<16x128xf32, #tpu.memory_space<vmem>>, vector<16x128xf32>
    %5 = arith.truncf %4 : vector<16x128xf32> to vector<16x128xbf16>
    %c0_4 = arith.constant 0 : index
    %c0_5 = arith.constant 0 : index
    %6 = vector.load %arg3[%c0_4, %c0_5] : memref<128x32xf32, #tpu.memory_space<vmem>>, vector<128x32xf32>
    %7 = arith.truncf %6 : vector<128x32xf32> to vector<128x32xbf16>
    %cst = arith.constant dense<0.000000e+00> : vector<16x32xf32>
    %8 = tpu.matmul %5, %7, %cst {dimension_numbers = #tpu.dot_dimension_numbers<[1], [0], [0], [1], [0, 0, 1, 1], [], []>} : vector<16x128xbf16>, vector<128x32xbf16>, vector<16x32xf32> -> vector<16x32xf32>
    %9 = arith.addf %3, %8 : vector<16x32xf32>
    %c0_6 = arith.constant 0 : index
    %c0_7 = arith.constant 0 : index
    %10 = vector.load %arg9[%c0_6, %c0_7] : memref<16x32xf32, #tpu.memory_space<vmem>>, vector<16x32xf32>
    tpu.vector_store %arg9[%c0_6, %c0_7], %9 {strides = array<i32>} : memref<16x32xf32, #tpu.memory_space<vmem>>, vector<16x32xf32>,
    %c0_i32_8 = arith.constant 0 : i32
    %11 = arith.cmpi eq, %arg1, %c0_i32_8 : i32
    %12 = arith.extui %11 : i1 to i32
    %c0_i32_9 = arith.constant 0 : i32
    %13 = arith.cmpi ne, %12, %c0_i32_9 : i32
    scf.if %13 {
      %c0_10 = arith.constant 0 : index
      %c0_11 = arith.constant 0 : index
      %14 = vector.load %arg9[%c0_10, %c0_11] : memref<16x32xf32, #tpu.memory_space<vmem>>, vector<16x32xf32>
      %c0_12 = arith.constant 0 : index
      %c0_13 = arith.constant 0 : index
      %15 = vector.load %arg4[%c0_12, %c0_13] : memref<1x32xf32, #tpu.memory_space<vmem>>, vector<1x32xf32>
      %16 = vector.broadcast %15 : vector<1x32xf32> to vector<16x32xf32>
      %17 = arith.addf %14, %16 : vector<16x32xf32>
      %c0_14 = arith.constant 0 : index
      %c0_15 = arith.constant 0 : index
      %18 = vector.load %arg5[%c0_14, %c0_15] : memref<16x32xf32, #tpu.memory_space<vmem>>, vector<16x32xf32>
      %19 = arith.addf %17, %18 : vector<16x32xf32>
      %cst_16 = arith.constant dense<0.000000e+00> : vector<16xf32>
      %20 = vector.multi_reduction <add>, %19, %cst_16 [1] : vector<16x32xf32> to vector<16xf32>
      %21 = vector.shape_cast %20 : vector<16xf32> to vector<16x1xf32>
      %cst_17 = arith.constant 3.200000e+01 : f32
      %22 = vector.broadcast %cst_17 : f32 to vector<16x1xf32>
      %23 = arith.divf %21, %22 : vector<16x1xf32>
      %24 = vector.broadcast %23 : vector<16x1xf32> to vector<16x32xf32>
      %25 = arith.subf %19, %24 : vector<16x32xf32>
      %26 = arith.mulf %25, %25 : vector<16x32xf32>
      %cst_18 = arith.constant dense<0.000000e+00> : vector<16xf32>
      %27 = vector.multi_reduction <add>, %26, %cst_18 [1] : vector<16x32xf32> to vector<16xf32>
      %28 = vector.shape_cast %27 : vector<16xf32> to vector<16x1xf32>
      %cst_19 = arith.constant 3.200000e+01 : f32
      %29 = vector.broadcast %cst_19 : f32 to vector<16x1xf32>
      %30 = arith.divf %28, %29 : vector<16x1xf32>
      %31 = vector.broadcast %23 : vector<16x1xf32> to vector<16x32xf32>
      %32 = arith.subf %19, %31 : vector<16x32xf32>
      %cst_20 = arith.constant 9.99999974E-6 : f32
      %33 = vector.broadcast %cst_20 : f32 to vector<16x1xf32>
      %34 = arith.addf %30, %33 : vector<16x1xf32>
      %35 = math.rsqrt %34 : vector<16x1xf32>
      %36 = vector.broadcast %35 : vector<16x1xf32> to vector<16x32xf32>
      %37 = arith.mulf %32, %36 : vector<16x32xf32>
      %c0_21 = arith.constant 0 : index
      %c0_22 = arith.constant 0 : index
      %38 = vector.load %arg6[%c0_21, %c0_22] : memref<1x32xf32, #tpu.memory_space<vmem>>, vector<1x32xf32>
      %39 = vector.broadcast %38 : vector<1x32xf32> to vector<16x32xf32>
      %40 = arith.mulf %37, %39 : vector<16x32xf32>
      %c0_23 = arith.constant 0 : index
      %c0_24 = arith.constant 0 : index
      %41 = vector.load %arg7[%c0_23, %c0_24] : memref<1x32xf32, #tpu.memory_space<vmem>>, vector<1x32xf32>
      %42 = vector.broadcast %41 : vector<1x32xf32> to vector<16x32xf32>
      %43 = arith.addf %40, %42 : vector<16x32xf32>
      %c0_25 = arith.constant 0 : index
      %c0_26 = arith.constant 0 : index
      %44 = vector.load %arg8[%c0_25, %c0_26] : memref<16x32xf32, #tpu.memory_space<vmem>>, vector<16x32xf32>
      tpu.vector_store %arg8[%c0_25, %c0_26], %43 {strides = array<i32>} : memref<16x32xf32, #tpu.memory_space<vmem>>, vector<16x32xf32>,
    } else {
    }
    return
  }
  func.func @transform_0(%arg0: i32, %arg1: i32) -> (i32, i32) {
    %c0_i32 = arith.constant 0 : i32
    return %arg0, %arg1 : i32, i32
  }
  func.func @transform_1(%arg0: i32, %arg1: i32) -> (i32, i32) {
    %c0_i32 = arith.constant 0 : i32
    %c0_i32_0 = arith.constant 0 : i32
    return %arg1, %c0_i32 : i32, i32
  }
  func.func @transform_2(%arg0: i32, %arg1: i32) -> (i32, i32) {
    %c0_i32 = arith.constant 0 : i32
    %c0_i32_0 = arith.constant 0 : i32
    %c0_i32_1 = arith.constant 0 : i32
    return %c0_i32, %c0_i32_0 : i32, i32
  }
  func.func @transform_3(%arg0: i32, %arg1: i32) -> (i32, i32) {
    %c0_i32 = arith.constant 0 : i32
    %c0_i32_0 = arith.constant 0 : i32
    return %arg0, %c0_i32 : i32, i32
  }
  func.func @transform_4(%arg0: i32, %arg1: i32) -> (i32, i32) {
    %c0_i32 = arith.constant 0 : i32
    %c0_i32_0 = arith.constant 0 : i32
    %c0_i32_1 = arith.constant 0 : i32
    return %c0_i32, %c0_i32_0 : i32, i32
  }
  func.func @transform_5(%arg0: i32, %arg1: i32) -> (i32, i32) {
    %c0_i32 = arith.constant 0 : i32
    %c0_i32_0 = arith.constant 0 : i32
    %c0_i32_1 = arith.constant 0 : i32
    return %c0_i32, %c0_i32_0 : i32, i32
  }
  func.func @transform_6(%arg0: i32, %arg1: i32) -> (i32, i32) {
    %c0_i32 = arith.constant 0 : i32
    %c0_i32_0 = arith.constant 0 : i32
    return %arg0, %c0_i32 : i32, i32
  }
}

module attributes {stable_mosaic.version = 11 : i64} {
  func.func @_linear_kernel(%arg0: i32, %arg1: i32, %arg2: i32, %arg3: memref<16x32xf32, #tpu.memory_space<vmem>>, %arg4: memref<32x16xf32, #tpu.memory_space<vmem>>, %arg5: memref<1x16xf32, #tpu.memory_space<vmem>>, %arg6: memref<16x16xf32, #tpu.memory_space<vmem>>, %arg7: memref<16x16xf32, #tpu.memory_space<vmem>>) attributes {dimension_semantics = [#tpu.dimension_semantics<parallel>, #tpu.dimension_semantics<parallel>, #tpu.dimension_semantics<arbitrary>], iteration_bounds = array<i64: 1, 1, 1>, scalar_prefetch = 0 : i64, scratch_operands = 1 : i64, tpu.core_type = #tpu.core_type<tc>, window_params = [{transform_indices = @transform_0, window_bounds = array<i64: 16, 32>}, {transform_indices = @transform_1, window_bounds = array<i64: 32, 16>}, {transform_indices = @transform_2, window_bounds = array<i64: 1, 16>}, {transform_indices = @transform_3, window_bounds = array<i64: 16, 16>}]} {
    %c0_i32 = arith.constant 0 : i32
    %0 = arith.cmpi eq, %arg2, %c0_i32 : i32
    %1 = arith.extui %0 : i1 to i32
    %c0_i32_0 = arith.constant 0 : i32
    %2 = arith.cmpi ne, %1, %c0_i32_0 : i32
    scf.if %2 {
      %cst_10 = arith.constant 0.000000e+00 : f32
      %14 = vector.broadcast %cst_10 : f32 to vector<16x16xf32>
      %c0_11 = arith.constant 0 : index
      %c0_12 = arith.constant 0 : index
      %15 = vector.load %arg7[%c0_11, %c0_12] : memref<16x16xf32, #tpu.memory_space<vmem>>, vector<16x16xf32>
      tpu.vector_store %arg7[%c0_11, %c0_12], %14 {strides = array<i32>} : memref<16x16xf32, #tpu.memory_space<vmem>>, vector<16x16xf32>,
    } else {
    }
    %c0 = arith.constant 0 : index
    %c0_1 = arith.constant 0 : index
    %3 = vector.load %arg7[%c0, %c0_1] : memref<16x16xf32, #tpu.memory_space<vmem>>, vector<16x16xf32>
    %c0_2 = arith.constant 0 : index
    %c0_3 = arith.constant 0 : index
    %4 = vector.load %arg3[%c0_2, %c0_3] : memref<16x32xf32, #tpu.memory_space<vmem>>, vector<16x32xf32>
    %5 = arith.truncf %4 : vector<16x32xf32> to vector<16x32xbf16>
    %c0_4 = arith.constant 0 : index
    %c0_5 = arith.constant 0 : index
    %6 = vector.load %arg4[%c0_4, %c0_5] : memref<32x16xf32, #tpu.memory_space<vmem>>, vector<32x16xf32>
    %7 = arith.truncf %6 : vector<32x16xf32> to vector<32x16xbf16>
    %cst = arith.constant dense<0.000000e+00> : vector<16x16xf32>
    %8 = tpu.matmul %5, %7, %cst {dimension_numbers = #tpu.dot_dimension_numbers<[1], [0], [0], [1], [0, 0, 1, 1], [], []>} : vector<16x32xbf16>, vector<32x16xbf16>, vector<16x16xf32> -> vector<16x16xf32>
    %9 = arith.addf %3, %8 : vector<16x16xf32>
    %c0_6 = arith.constant 0 : index
    %c0_7 = arith.constant 0 : index
    %10 = vector.load %arg7[%c0_6, %c0_7] : memref<16x16xf32, #tpu.memory_space<vmem>>, vector<16x16xf32>
    tpu.vector_store %arg7[%c0_6, %c0_7], %9 {strides = array<i32>} : memref<16x16xf32, #tpu.memory_space<vmem>>, vector<16x16xf32>,
    %c0_i32_8 = arith.constant 0 : i32
    %11 = arith.cmpi eq, %arg2, %c0_i32_8 : i32
    %12 = arith.extui %11 : i1 to i32
    %c0_i32_9 = arith.constant 0 : i32
    %13 = arith.cmpi ne, %12, %c0_i32_9 : i32
    scf.if %13 {
      %c0_10 = arith.constant 0 : index
      %c0_11 = arith.constant 0 : index
      %14 = vector.load %arg7[%c0_10, %c0_11] : memref<16x16xf32, #tpu.memory_space<vmem>>, vector<16x16xf32>
      %c0_12 = arith.constant 0 : index
      %c0_13 = arith.constant 0 : index
      %15 = vector.load %arg5[%c0_12, %c0_13] : memref<1x16xf32, #tpu.memory_space<vmem>>, vector<1x16xf32>
      %16 = vector.broadcast %15 : vector<1x16xf32> to vector<16x16xf32>
      %17 = arith.addf %14, %16 : vector<16x16xf32>
      %c0_14 = arith.constant 0 : index
      %c0_15 = arith.constant 0 : index
      %18 = vector.load %arg6[%c0_14, %c0_15] : memref<16x16xf32, #tpu.memory_space<vmem>>, vector<16x16xf32>
      tpu.vector_store %arg6[%c0_14, %c0_15], %17 {strides = array<i32>} : memref<16x16xf32, #tpu.memory_space<vmem>>, vector<16x16xf32>,
    } else {
    }
    return
  }
  func.func @transform_0(%arg0: i32, %arg1: i32, %arg2: i32) -> (i32, i32) {
    %c0_i32 = arith.constant 0 : i32
    return %arg0, %arg2 : i32, i32
  }
  func.func @transform_1(%arg0: i32, %arg1: i32, %arg2: i32) -> (i32, i32) {
    %c0_i32 = arith.constant 0 : i32
    return %arg2, %arg1 : i32, i32
  }
  func.func @transform_2(%arg0: i32, %arg1: i32, %arg2: i32) -> (i32, i32) {
    %c0_i32 = arith.constant 0 : i32
    %c0_i32_0 = arith.constant 0 : i32
    return %c0_i32, %arg1 : i32, i32
  }
  func.func @transform_3(%arg0: i32, %arg1: i32, %arg2: i32) -> (i32, i32) {
    %c0_i32 = arith.constant 0 : i32
    return %arg0, %arg1 : i32, i32
  }
}

</mosaic_0001>

<bundles_post_ra>
// kernel: ie_mask_transformer_forward.22
= control target key start
LH: loop header
LB: loop body
LE: loop exit
PB: predicated region body
PF: predicated region fallthrough
CT: control target
= control target key end

     0   :  { %vm19_vm0 = vcmask 261120   ;;  %v117_v0 = vmov 0.0   ;;  %vm118_vm1 = vmmov 0   ;;  %s173_s1 = inlined_call_operand.vmem [shape: f32[32,32], index: 1, kind: input, shape index: {}]   ;;  %s174_s0 = inlined_call_operand.vmem [shape: f32[16,32], index: 0, kind: input, shape index: {}]   ;;  %s175_s2 = inlined_call_operand.vmem [shape: f32[1,32], index: 2, kind: input, shape index: {}]   ;;  %s176_s3 = inlined_call_operand.vmem [shape: f32[16,32], index: 3, kind: output, shape index: {}]  }
   0x1   :  { %107 = vmatprep.subr.bf16.mxu0 %v117_v0  ;;  %v27_v1 = vld [vmem:[%s173_s1] sm:$0xff]  ;;  %v28_v2 = vld [vmem:[%s173_s1 + $0x8] sm:$0xff]  ;;  %v29_v3 = vld [vmem:[%s173_s1 + $0x10] sm:$0xff]  ;;  %111 = vmatprep.mubr.msk.bf16.mxu0 %vm118_vm1, %v117_v0  ;;  %20 = vst.msk [vmem:[#allocation2] sm:$0xff] %vm19_vm0, %v117_v0 }
   0x2   :  { %21 = vst.msk [vmem:[#allocation2 + $0x8] sm:$0xff] %vm19_vm0, %v117_v0  ;;  %v31_v4 = vpack.c.bf16 %v28_v2, %v27_v1  ;;  %v30_v5 = vld [vmem:[%s173_s1 + $0x18] sm:$0xff]  ;;  %v24_v7 = vld [vmem:[%s174_s0] sm:$0xff]  ;;  %v25_v8 = vld [vmem:[%s174_s0 + $0x8] sm:$0xff] }
   0x3   :  { %v32_v6 = vpack.c.bf16 %v30_v5, %v29_v3  ;;  %v26_v9 = vpack.c.bf16 %v25_v8, %v24_v7  ;;  %v103_v18 = vld [vmem:[%s175_s2] ss:$0 sm:$0xff] }
   0x4   :  { %108 = vmatpush3.bf16.msra.mxu0 %v31_v4 }
   0x5   :  { %109 = vmatprep.subr.bf16.mxu0 %v117_v0 }
   0x8   :  { %110 = vmatpush3.bf16.msra.mxu0 %v32_v6  ;;  %v22_v10 = vld [vmem:[#allocation2] sm:$0xff] }
   0x9   :  { %v23_v12 = vld [vmem:[#allocation2 + $0x8] sm:$0xff] }
   0xb   :  { %112 = vmatmul.mubr.msk.bf16.vlgmr.msra.gmra.mrb[0].mxu0 %vm19_vm0, %v26_v9 }
  0xde   :  { %v71_v11 = vpop.f32.mrb[0].mxu0 }
  0xdf   :  { %v78_v13 = vadd.f32 %v71_v11, %v22_v10  ;;  %v113_v14 = vpop.f32.mrb[1].mxu0 }
  0xe0   :  { %v74_v15 = vpop.f32.mrb[2].mxu0 }
  0xe1   :  { %80 = vst.msk [vmem:[#allocation2] sm:$0xff] %vm19_vm0, %v78_v13  ;;  %v79_v16 = vadd.f32 %v74_v15, %v23_v12  ;;  %v114_v17 = vpop.f32.mrb[3].mxu0 }
  0xe3   :  { %81 = vst.msk [vmem:[#allocation2 + $0x8] sm:$0xff] %vm19_vm0, %v79_v16 }
  0xe8   :  { %v85_v19 = vld [vmem:[#allocation2] sm:$0xff] }
  0xe9   :  { %v94_v20 = vadd.f32 %v103_v18, %v85_v19 }
  0xea   :  { %v86_v21 = vld [vmem:[#allocation2 + $0x8] sm:$0xff] }
  0xeb   :  { %96 = vst.msk [vmem:[%s176_s3] sm:$0xff] %vm19_vm0, %v94_v20  ;;  %v95_v22 = vadd.f32 %v103_v18, %v86_v21 }
  0xed   :  { %97 = vst.msk [vmem:[%s176_s3 + $0x8] sm:$0xff] %vm19_vm0, %v95_v22 }

// kernel: ie_mask_transformer_forward.19
= control target key start
LH: loop header
LB: loop body
LE: loop exit
PB: predicated region body
PF: predicated region fallthrough
CT: control target
= control target key end

     0   :  { %vm19_vm0 = vcmask 785408   ;;  %v118_v0 = vmov 0.0   ;;  %vm119_vm1 = vmmov 0   ;;  %vm33_vm2 = vcmask 261120   ;;  %s173_s1 = inlined_call_operand.vmem [shape: f32[32,96], index: 1, kind: input, shape index: {}]   ;;  %s174_s0 = inlined_call_operand.vmem [shape: f32[16,32], index: 0, kind: input, shape index: {}]   ;;  %s175_s2 = inlined_call_operand.vmem [shape: f32[1,96], index: 2, kind: input, shape index: {}]   ;;  %s176_s3 = inlined_call_operand.vmem [shape: f32[16,96], index: 3, kind: output, shape index: {}]  }
   0x1   :  { %108 = vmatprep.subr.bf16.mxu0 %v118_v0  ;;  %v27_v1 = vld [vmem:[%s173_s1] sm:$0xff]  ;;  %v28_v2 = vld [vmem:[%s173_s1 + $0x8] sm:$0xff]  ;;  %v29_v3 = vld [vmem:[%s173_s1 + $0x10] sm:$0xff]  ;;  %112 = vmatprep.mubr.msk.bf16.mxu0 %vm119_vm1, %v118_v0  ;;  %20 = vst.msk [vmem:[#allocation2] sm:$0xff] %vm19_vm0, %v118_v0 }
   0x2   :  { %21 = vst.msk [vmem:[#allocation2 + $0x8] sm:$0xff] %vm19_vm0, %v118_v0  ;;  %v31_v4 = vpack.c.bf16 %v28_v2, %v27_v1  ;;  %v30_v5 = vld [vmem:[%s173_s1 + $0x18] sm:$0xff]  ;;  %v24_v7 = vld [vmem:[%s174_s0] sm:$0xff]  ;;  %v25_v8 = vld [vmem:[%s174_s0 + $0x8] sm:$0xff] }
   0x3   :  { %v32_v6 = vpack.c.bf16 %v30_v5, %v29_v3  ;;  %v26_v9 = vpack.c.bf16 %v25_v8, %v24_v7  ;;  %v104_v18 = vld [vmem:[%s175_s2] ss:$0 sm:$0xff] }
   0x4   :  { %109 = vmatpush3.bf16.msra.mxu0 %v31_v4 }
   0x5   :  { %110 = vmatprep.subr.bf16.mxu0 %v118_v0 }
   0x8   :  { %111 = vmatpush3.bf16.msra.mxu0 %v32_v6  ;;  %v22_v10 = vld [vmem:[#allocation2] sm:$0xff] }
   0x9   :  { %v23_v12 = vld [vmem:[#allocation2 + $0x8] sm:$0xff] }
   0xb   :  { %113 = vmatmul.mubr.msk.bf16.vlgmr.msra.gmra.mrb[0].mxu0 %vm33_vm2, %v26_v9 }
  0xde   :  { %v71_v11 = vpop.f32.mrb[0].mxu0 }
  0xdf   :  { %v78_v13 = vadd.f32 %v71_v11, %v22_v10  ;;  %v114_v14 = vpop.f32.mrb[1].mxu0 }
  0xe0   :  { %v74_v15 = vpop.f32.mrb[2].mxu0 }
  0xe1   :  { %81 = vst.msk [vmem:[#allocation2] sm:$0xff] %vm19_vm0, %v78_v13  ;;  %v79_v16 = vadd.f32 %v74_v15, %v23_v12  ;;  %v115_v17 = vpop.f32.mrb[3].mxu0 }
  0xe3   :  { %82 = vst.msk [vmem:[#allocation2 + $0x8] sm:$0xff] %vm19_vm0, %v79_v16 }
  0xe8   :  { %v86_v19 = vld [vmem:[#allocation2] sm:$0xff] }
  0xe9   :  { %v95_v20 = vadd.f32 %v104_v18, %v86_v19 }
  0xea   :  { %v87_v21 = vld [vmem:[#allocation2 + $0x8] sm:$0xff] }
  0xeb   :  { %97 = vst.msk [vmem:[%s176_s3] sm:$0xff] %vm19_vm0, %v95_v20  ;;  %v96_v22 = vadd.f32 %v104_v18, %v87_v21 }
  0xed   :  { %98 = vst.msk [vmem:[%s176_s3 + $0x8] sm:$0xff] %vm19_vm0, %v96_v22 }

// kernel: ie_mask_transformer_forward.21
= control target key start
LH: loop header
LB: loop body
LE: loop exit
PB: predicated region body
PF: predicated region fallthrough
CT: control target
= control target key end

     0   :  { %vm28_vm0 = vcmask 261120   ;;  %v181_v0 = vmov 0.0   ;;  %vm182_vm1 = vmmov 0   ;;  %s268_s1 = inlined_call_operand.vmem [shape: f32[32,32], index: 1, kind: input, shape index: {}]   ;;  %s269_s0 = inlined_call_operand.vmem [shape: f32[16,32], index: 0, kind: input, shape index: {}]   ;;  %s270_s2 = inlined_call_operand.vmem [shape: f32[1,32], index: 2, kind: input, shape index: {}]   ;;  %s271_s3 = inlined_call_operand.vmem [shape: f32[16,32], index: 3, kind: input, shape index: {}]   ;;  %s272_s4 = inlined_call_operand.vmem [shape: f32[1,32], index: 4, kind: input, shape index: {}]   ;;  %s273_s5 = inlined_call_operand.vmem [shape: f32[1,32], index: 5, kind: input, shape index: {}]   ;;  %s274_s6 = inlined_call_operand.vmem [shape: f32[16,32], index: 6, kind: output, shape index: {}]  }
   0x1   :  { %167 = vmatprep.subr.bf16.mxu0 %v181_v0  ;;  %v36_v1 = vld [vmem:[%s268_s1] sm:$0xff]  ;;  %v37_v2 = vld [vmem:[%s268_s1 + $0x8] sm:$0xff]  ;;  %v38_v3 = vld [vmem:[%s268_s1 + $0x10] sm:$0xff]  ;;  %171 = vmatprep.mubr.msk.bf16.mxu0 %vm182_vm1, %v181_v0  ;;  %29 = vst.msk [vmem:[#allocation2] sm:$0xff] %vm28_vm0, %v181_v0 }
   0x2   :  { %30 = vst.msk [vmem:[#allocation2 + $0x8] sm:$0xff] %vm28_vm0, %v181_v0  ;;  %v40_v4 = vpack.c.bf16 %v37_v2, %v36_v1  ;;  %v39_v5 = vld [vmem:[%s268_s1 + $0x18] sm:$0xff]  ;;  %v33_v7 = vld [vmem:[%s269_s0] sm:$0xff]  ;;  %v34_v8 = vld [vmem:[%s269_s0 + $0x8] sm:$0xff] }
   0x3   :  { %v41_v6 = vpack.c.bf16 %v39_v5, %v38_v3  ;;  %v35_v9 = vpack.c.bf16 %v34_v8, %v33_v7  ;;  %v161_v18 = vld [vmem:[%s270_s2] ss:$0 sm:$0xff]  ;;  %v106_v23 = vld [vmem:[%s271_s3 + $0x8] sm:$0xff] }
   0x4   :  { %168 = vmatpush3.bf16.msra.mxu0 %v40_v4  ;;  %v105_v20 = vld [vmem:[%s271_s3] sm:$0xff] }
   0x5   :  { %169 = vmatprep.subr.bf16.mxu0 %v181_v0  ;;  %v162_v46 = vld [vmem:[%s272_s4] ss:$0 sm:$0xff] }
   0x6   :  { %v163_v48 = vld [vmem:[%s273_s5] ss:$0 sm:$0xff] }
   0x8   :  { %170 = vmatpush3.bf16.msra.mxu0 %v41_v6  ;;  %v31_v10 = vld [vmem:[#allocation2] sm:$0xff] }
   0x9   :  { %v32_v12 = vld [vmem:[#allocation2 + $0x8] sm:$0xff] }
   0xb   :  { %172 = vmatmul.mubr.msk.bf16.vlgmr.msra.gmra.mrb[0].mxu0 %vm28_vm0, %v35_v9 }
  0xde   :  { %v80_v11 = vpop.f32.mrb[0].mxu0 }
  0xdf   :  { %v87_v13 = vadd.f32 %v80_v11, %v31_v10  ;;  %v173_v14 = vpop.f32.mrb[1].mxu0 }
  0xe0   :  { %v83_v15 = vpop.f32.mrb[2].mxu0 }
  0xe1   :  { %89 = vst.msk [vmem:[#allocation2] sm:$0xff] %vm28_vm0, %v87_v13  ;;  %v88_v16 = vadd.f32 %v83_v15, %v32_v12  ;;  %v174_v17 = vpop.f32.mrb[3].mxu0 }
  0xe3   :  { %90 = vst.msk [vmem:[#allocation2 + $0x8] sm:$0xff] %vm28_vm0, %v88_v16 }
  0xe8   :  { %v94_v19 = vld [vmem:[#allocation2] sm:$0xff] }
  0xe9   :  { %v103_v21 = vadd.f32 %v161_v18, %v94_v19 }
  0xea   :  { %v95_v22 = vld [vmem:[#allocation2 + $0x8] sm:$0xff] }
  0xeb   :  { %v107_v24 = vadd.f32 %v105_v20, %v103_v21  ;;  %v104_v25 = vadd.f32 %v161_v18, %v95_v22 }
  0xed   :  { %v109_v26 = vsel %vm28_vm0, %v107_v24, 0.0  ;;  %v108_v27 = vadd.f32 %v106_v23, %v104_v25 }
  0xee   :  { %110 = vadd.xlane.f32.xlu0 %v109_v26 }
  0xef   :  { %v112_v28 = vsel %vm28_vm0, %v108_v27, 0.0 }
  0xf2   :  { %113 = vadd.xlane.f32.xlu0 %v112_v28 }
 0x17b   :  { %v111_v29 = vpop.xlane.xlu0 %110 }
 0x17c   :  { %v116_v30 = vmul.f32 0.03125, %v111_v29 }
 0x17e   :  { %v118_v31 = vsub.f32 %v107_v24, %v116_v30 }
 0x17f   :  { %v114_v32 = vpop.xlane.xlu0 %113 }
 0x180   :  { %v117_v33 = vmul.f32 0.03125, %v114_v32  ;;  %v120_v34 = vmul.f32 %v118_v31, %v118_v31 }
 0x182   :  { %v119_v35 = vsub.f32 %v108_v27, %v117_v33  ;;  %v122_v36 = vsel %vm28_vm0, %v120_v34, 0.0 }
 0x183   :  { %123 = vadd.xlane.f32.xlu1 %v122_v36 }
 0x184   :  { %v121_v37 = vmul.f32 %v119_v35, %v119_v35 }
 0x186   :  { %v125_v38 = vsel %vm28_vm0, %v121_v37, 0.0 }
 0x187   :  { %126 = vadd.xlane.f32.xlu1 %v125_v38 }
 0x210   :  { %v124_v39 = vpop.xlane.xlu1 %123 }
 0x211   :  { %v128_v40 = vmul.f32 0.03125, %v124_v39 }
 0x213   :  { %v130_v41 = vadd.f32 1e-05, %v128_v40 }
 0x214   :  { %v127_v42 = vpop.xlane.xlu1 %126 }
 0x215   :  { %177 = vrsqrt.f32 %v130_v41  ;;  %v129_v43 = vmul.f32 0.03125, %v127_v42 }
 0x217   :  { %v131_v44 = vadd.f32 1e-05, %v129_v43 }
 0x219   :  { %179 = vrsqrt.f32 %v131_v44 }
 0x21f   :  { %v178_v45 = vpop.eup %177 }
 0x220   :  { %v134_v47 = vmul.f32 %v178_v45, %v118_v31 }
 0x222   :  { %v143_v49 = vmul.f32 %v162_v46, %v134_v47 }
 0x223   :  { %v180_v50 = vpop.eup %179 }
 0x224   :  { %v152_v51 = vadd.f32 %v163_v48, %v143_v49  ;;  %v135_v52 = vmul.f32 %v180_v50, %v119_v35 }
 0x226   :  { %154 = vst.msk [vmem:[%s274_s6] sm:$0xff] %vm28_vm0, %v152_v51  ;;  %v144_v53 = vmul.f32 %v162_v46, %v135_v52 }
 0x228   :  { %v153_v54 = vadd.f32 %v163_v48, %v144_v53 }
 0x22a   :  { %155 = vst.msk [vmem:[%s274_s6 + $0x8] sm:$0xff] %vm28_vm0, %v153_v54 }

// kernel: ie_mask_transformer_forward.20
= control target key start
LH: loop header
LB: loop body
LE: loop exit
PB: predicated region body
PF: predicated region fallthrough
CT: control target
= control target key end

     0   :  { %s849_s9 = smov 0   ;;  %s945_s0 = inlined_call_operand.vmem [shape: f32[2,8,96], index: 0, kind: input, shape index: {}]   ;;  %s946_s1 = inlined_call_operand.vmem [shape: f32[2,1,8], index: 1, kind: input, shape index: {}]   ;;  %s947_s2 = inlined_call_operand.vmem [shape: f32[2,8,32], index: 2, kind: output, shape index: {}]  }
   0x1 LB: > { %s688_s10 = sadd.s32 4294967295, %s816_s9   ;;  %p692_p0 = scmp.ge.s32.totalorder %s816_s9, 1  ;;  %s816_s9 = sphi %s849_s9, %s12_s9  }
   0x2   : > { %p119_p1 = scmp.lt.s32.totalorder %s816_s9, 3 }
   0x4   : > { %p120_p2 = pnand %p692_p0, %p119_p1 }
   0x5   : > { %p142_p3 = scmp.lt.s32.totalorder (!%p120_p2), %s688_s10, 1  ;;  %v818_v0 = vmov (!%p120_p2), 0.0   ;;  %vm819_vm0 = vmmov (!%p120_p2), 0   ;;  %s820_s15 = smov (!%p120_p2), 96   ;;  %vm168_vm1 = vcmask (!%p120_p2), 64512   ;;  %vm232_vm2 = vcmask (!%p120_p2), 1043456  }
   0x6   : > { %123 = sbr.rel (%p120_p2) target bundleno = 1600 (0x640), region = 28  ;;  %722 = vmatprep.subr.bf16.mxu0 (!%p120_p2), %v818_v0  ;;  %724 = vmatprep.mubr.msk.bf16.mxu0 (!%p120_p2), %vm819_vm0, %v818_v0  ;;  %s821_s16 = smov (!%p120_p2), 64   ;;  %vm620_vm3 = vcmask (!%p120_p2), 130048   ;;  %vm622_vm4 = vcmask (!%p120_p2), 195584   ;;  %vm624_vm5 = vcmask (!%p120_p2), 261120  }
   0x7   : > { %728 = vmatprep.subr.bf16.mxu1 (!%p120_p2), %v818_v0  ;;  %730 = vmatprep.mubr.msk.bf16.mxu1 (!%p120_p2), %vm819_vm0, %v818_v0  ;;  %s822_s17 = smov (!%p120_p2), 88   ;;  %s823_s21 = smov (!%p120_p2), 72  }
   0x8   : > { %s824_s22 = smov (!%p120_p2), 120   ;;  %s825_s23 = smov (!%p120_p2), 80  }
   0x9   : > { %s826_s24 = smov (!%p120_p2), 112   ;;  %s827_s25 = smov (!%p120_p2), 104  }
   0xa   : > { %s828_s26 = smov (!%p120_p2), 56   ;;  %s829_s27 = smov (!%p120_p2), 48  }
   0xb   : > { %s830_s28 = smov (!%p120_p2), 40   ;;  %s831_s29 = smov (!%p120_p2), 8  }
   0xc   : > { %s832_s30 = smov (!%p120_p2), 16   ;;  %s833_s3 = smov (!%p120_p2), 24  }
   0xd   : > { %s949_s10 = smov (!%p142_p3, %s688_s10), 1 }
   0xe   : > { %s693_s11 = sshll.u32 %s949_s10, 3  ;;  %s148_s20 = scalar_lea.vmem %s946_s1, %s949_s10 }
   0xf   : > { %s145_s14 = scalar_lea.vmem %s945_s0, %s693_s11  ;;  %v885_v7 = vld [vmem:[%s148_s20] ss:$0 sm:$0xff]  ;;  %s152_s6 = scalar_lea.vmem %s947_s2, %s693_s11 }
  0x10   : > { %v154_v1 = vld [vmem:[%s145_s14] sm:$0xff] }
  0x11   : > { %v871_v2 = vpack.c.bf16 %v154_v1, %v154_v1  ;;  %v156_v5 = vmul.f32 0.35355338, %v154_v1 }
  0x13   : > { %166 = vrot.lane.b32.xlu0 %v871_v2, %s820_s15  ;;  %v157_v6 = vpack.c.bf16 %v156_v5, %v156_v5  ;;  %227 = vrot.lane.b32.xlu1 %v871_v2, %s821_s16 }
  0x17   : > { %279 = vrot.lane.b32.xlu1 %v871_v2, %s822_s17 }
  0x85   : > { %v167_v3 = vpop.permute.xlu0 %166  ;;  %v228_v14 = vpop.permute.xlu1 %227 }
  0x86   : > { %v173_v4 = vsel %vm168_vm1, %v167_v3, 0  ;;  %v234_v15 = vsel %vm232_vm2, %v228_v14, 0 }
  0x87   : > { %723 = vmatpush3.bf16.xpose.msra.mxu0 %v173_v4  ;;  %729 = vmatpush3.bf16.msra.mxu1 %v234_v15 }
  0x88   : > { %740 = vmatprep.subr.bf16.mxu0 %v818_v0  ;;  %734 = vmatprep.subr.bf16.mxu1 %v818_v0 }
  0x89   : > { %v280_v21 = vpop.permute.xlu1 %279 }
  0x8a   : > { %v285_v27 = vsel %vm168_vm1, %v280_v21, 0 }
  0x8e   : > { %725 = vmatmul.mubr.msk.bf16.vlgmr.msra.gmra.mrb[0].mxu0 %vm168_vm1, %v157_v6 }
  0x8f   : > { %742 = vmatprep.mubr.msk.bf16.mxu0 %vm819_vm0, %v818_v0 }
 0x161   : > { %v209_v8 = vpop.f32.mrb[0].mxu0 }
 0x162   : > { %v210_v9 = vadd.f32 %v885_v7, %v209_v8  ;;  %v726_v10 = vpop.f32.mrb[1].mxu0 }
 0x163   : > { %v212_v11 = vpop.f32.mrb[2].mxu0 }
 0x164   : > { %v727_v12 = vpop.f32.mrb[3].mxu0  ;;  %v215_v13 = vsel %vm168_vm1, %v210_v9, -inf }
 0x165   : > { %216 = vmax.xlane.f32.xlu0 %v215_v13 }
 0x17b   : > { %499 = vrot.lane.b32.xlu0 %v871_v2, %s823_s21 }
 0x1f2   : > { %v217_v16 = vpop.xlane.xlu0 %216 }
 0x1f3   : > { %v218_v17 = vsub.f32 %v210_v9, %v217_v16 }
 0x1f5   : > { %v219_v18 = vmul.f32 1.442695, %v218_v17 }
 0x1f6   : > { %v500_v30 = vpop.permute.xlu0 %499 }
 0x1f7   : > { %794 = vpow2.f32 %v219_v18  ;;  %v505_v32 = vsel %vm168_vm1, %v500_v30, 0 }
 0x201   : > { %v795_v19 = vpop.eup %794 }
 0x202   : > { %v221_v20 = vsel %vm168_vm1, %v795_v19, 0.0 }
 0x203   : > { %222 = vadd.xlane.f32.xlu1 %v221_v20 }
 0x214   : > { %277 = vrot.lane.b32.xlu1 %v157_v6, %s824_s22 }
 0x218   : > { %389 = vrot.lane.b32.xlu1 %v871_v2, %s825_s23 }
 0x21c   : > { %387 = vrot.lane.b32.xlu1 %v157_v6, %s826_s24 }
 0x220   : > { %497 = vrot.lane.b32.xlu1 %v157_v6, %s827_s25 }
 0x290   : > { %v223_v22 = vpop.xlane.xlu1 %222 }
 0x291   : > { %796 = vrcp.f32 %v223_v22 }
 0x294   : > { %v278_v25 = vpop.permute.xlu1 %277 }
 0x298   : > { %v390_v28 = vpop.permute.xlu1 %389 }
 0x299   : > { %v395_v29 = vsel %vm168_vm1, %v390_v28, 0 }
 0x29b   : > { %v797_v23 = vpop.eup %796 }
 0x29c   : > { %v225_v24 = vmul.f32 %v797_v23, %v795_v19  ;;  %v388_v31 = vpop.permute.xlu1 %387 }
 0x29e   : > { %v226_v26 = vpack.c.bf16 %v225_v24, %v225_v24 }
 0x2a0   : > { %731 = vmatmul.mubr.msk.bf16.vlgmr.msra.gmra.mrb[0].mxu1 %vm168_vm1, %v226_v26  ;;  %v498_v33 = vpop.permute.xlu1 %497 }
 0x2a1   : > { %735 = vmatpush3.bf16.xpose.msra.mxu1 %v285_v27  ;;  %736 = vmatprep.mubr.msk.bf16.mxu1 %vm819_vm0, %v818_v0 }
 0x2a2   : > { %746 = vmatprep.subr.bf16.mxu1 %v818_v0 }
 0x2a8   : > { %737 = vmatmul.mubr.msk.bf16.vlgmr.msra.gmra.mrb[4].mxu1 %vm168_vm1, %v278_v25 }
 0x2a9   : > { %747 = vmatpush3.bf16.xpose.msra.mxu1 %v395_v29  ;;  %748 = vmatprep.mubr.msk.bf16.mxu1 %vm819_vm0, %v818_v0 }
 0x2aa   : > { %758 = vmatprep.subr.bf16.mxu1 %v818_v0 }
 0x2b0   : > { %749 = vmatmul.mubr.msk.bf16.vlgmr.msra.gmra.mrb[8].mxu1 %vm168_vm1, %v388_v31 }
 0x2b1   : > { %759 = vmatpush3.bf16.xpose.msra.mxu1 %v505_v32  ;;  %760 = vmatprep.mubr.msk.bf16.mxu1 %vm819_vm0, %v818_v0 }
 0x2b8   : > { %761 = vmatmul.mubr.msk.bf16.vlgmr.msra.gmra.mrb[12].mxu1 %vm168_vm1, %v498_v33 }
 0x373   : > { %v909_v34 = vpop.f32.mrb[0].mxu1 }
 0x374   : > { %v732_v35 = vpop.f32.mrb[1].mxu1 }
 0x375   : > { %v273_v36 = vpop.f32.mrb[2].mxu1 }
 0x376   : > { %v733_v37 = vpop.f32.mrb[3].mxu1 }
 0x37b   : > { %v321_v38 = vpop.f32.mrb[4].mxu1 }
 0x37c   : > { %v322_v39 = vadd.f32 %v885_v7, %v321_v38  ;;  %v738_v40 = vpop.f32.mrb[5].mxu1 }
 0x37d   : > { %v324_v41 = vpop.f32.mrb[6].mxu1 }
 0x37e   : > { %v739_v42 = vpop.f32.mrb[7].mxu1  ;;  %v327_v43 = vsel %vm168_vm1, %v322_v39, -inf }
 0x37f   : > { %328 = vmax.xlane.f32.xlu1 %v327_v43 }
 0x383   : > { %v431_v44 = vpop.f32.mrb[8].mxu1 }
 0x384   : > { %v432_v45 = vadd.f32 %v885_v7, %v431_v44  ;;  %v750_v46 = vpop.f32.mrb[9].mxu1 }
 0x385   : > { %v434_v47 = vpop.f32.mrb[10].mxu1 }
 0x386   : > { %v437_v48 = vsel %vm168_vm1, %v432_v45, -inf  ;;  %v751_v49 = vpop.f32.mrb[11].mxu1 }
 0x387   : > { %438 = vmax.xlane.f32.xlu0 %v437_v48 }
 0x38b   : > { %v541_v50 = vpop.f32.mrb[12].mxu1 }
 0x38c   : > { %v542_v51 = vadd.f32 %v885_v7, %v541_v50  ;;  %v762_v52 = vpop.f32.mrb[13].mxu1 }
 0x38d   : > { %v544_v53 = vpop.f32.mrb[14].mxu1 }
 0x38e   : > { %v547_v54 = vsel %vm168_vm1, %v542_v51, -inf  ;;  %v763_v55 = vpop.f32.mrb[15].mxu1 }
 0x38f   : > { %548 = vmax.xlane.f32.xlu1 %v547_v54 }
 0x40c   : > { %v329_v56 = vpop.xlane.xlu1 %328 }
 0x40d   : > { %v330_v57 = vsub.f32 %v322_v39, %v329_v56 }
 0x40f   : > { %v331_v58 = vmul.f32 1.442695, %v330_v57 }
 0x411   : > { %798 = vpow2.f32 %v331_v58 }
 0x414   : > { %v439_v4 = vpop.xlane.xlu0 %438 }
 0x415   : > { %v440_v5 = vsub.f32 %v432_v45, %v439_v4 }
 0x417   : > { %v441_v6 = vmul.f32 1.442695, %v440_v5 }
 0x41b   : > { %v799_v59 = vpop.eup %798 }
 0x41c   : > { %v549_v60 = vpop.xlane.xlu1 %548  ;;  %v333_v61 = vsel %vm168_vm1, %v799_v59, 0.0 }
 0x41d   : > { %v550_v62 = vsub.f32 %v542_v51, %v549_v60  ;;  %334 = vadd.xlane.f32.xlu1 %v333_v61 }
 0x41f   : > { %v551_v63 = vmul.f32 1.442695, %v550_v62 }
 0x421   : > { %800 = vpow2.f32 %v551_v63 }
 0x422   : > { %802 = vpow2.f32 %v441_v6 }
 0x42b   : > { %v801_v1 = vpop.eup %800 }
 0x42c   : > { %v553_v3 = vsel %vm168_vm1, %v801_v1, 0.0  ;;  %v803_v7 = vpop.eup %802 }
 0x42d   : > { %554 = vadd.xlane.f32.xlu0 %v553_v3  ;;  %v443_v8 = vsel %vm168_vm1, %v803_v7, 0.0 }
 0x42e   : > { %339 = vrot.lane.b32.xlu1 %v871_v2, %s828_s26 }
 0x443   : > { %449 = vrot.lane.b32.xlu0 %v871_v2, %s829_s27 }
 0x452   : > { %444 = vadd.xlane.f32.xlu1 %v443_v8 }
 0x463   : > { %559 = vrot.lane.b32.xlu1 %v871_v2, %s830_s28 }
 0x4aa   : > { %v335_v9 = vpop.xlane.xlu1 %334 }
 0x4ab   : > { %804 = vrcp.f32 %v335_v9 }
 0x4ae   : > { %v340_v10 = vpop.permute.xlu1 %339 }
 0x4af   : > { %v345_v11 = vsel %vm232_vm2, %v340_v10, 0 }
 0x4b0   : > { %741 = vmatpush3.bf16.msra.mxu0 %v345_v11 }
 0x4b1   : > { %752 = vmatprep.subr.bf16.mxu0 %v818_v0 }
 0x4b5   : > { %v805_v12 = vpop.eup %804 }
 0x4b6   : > { %v337_v13 = vmul.f32 %v805_v12, %v799_v59 }
 0x4b8   : > { %v338_v14 = vpack.c.bf16 %v337_v13, %v337_v13 }
 0x4ba   : > { %743 = vmatmul.mubr.msk.bf16.vlgmr.msra.gmra.mrb[4].mxu0 %vm168_vm1, %v338_v14  ;;  %v555_v15 = vpop.xlane.xlu0 %554 }
 0x4bb   : > { %754 = vmatprep.mubr.msk.bf16.mxu0 %vm819_vm0, %v818_v0 }
 0x4be   : > { %v450_v16 = vpop.permute.xlu0 %449 }
 0x4bf   : > { %v455_v2 = vsel %vm232_vm2, %v450_v16, 0 }
 0x4c0   : > { %753 = vmatpush3.bf16.msra.mxu0 %v455_v2 }
 0x4c1   : > { %764 = vmatprep.subr.bf16.mxu0 %v818_v0 }
 0x4df   : > { %v445_v17 = vpop.xlane.xlu1 %444 }
 0x4e0   : > { %806 = vrcp.f32 %v445_v17 }
 0x4e1   : > { %808 = vrcp.f32 %v555_v15 }
 0x4e3   : > { %v560_v19 = vpop.permute.xlu1 %559 }
 0x4e4   : > { %v565_v21 = vsel %vm232_vm2, %v560_v19, 0 }
 0x4ea   : > { %v807_v18 = vpop.eup %806 }
 0x4eb   : > { %v447_v20 = vmul.f32 %v807_v18, %v803_v7  ;;  %v809_v23 = vpop.eup %808 }
 0x4ec   : > { %v557_v24 = vmul.f32 %v809_v23, %v801_v1 }
 0x4ed   : > { %v448_v22 = vpack.c.bf16 %v447_v20, %v447_v20 }
 0x4ee   : > { %v558_v25 = vpack.c.bf16 %v557_v24, %v557_v24 }
 0x4ef   : > { %755 = vmatmul.mubr.msk.bf16.vlgmr.msra.gmra.mrb[8].mxu0 %vm168_vm1, %v448_v22 }
 0x4f0   : > { %765 = vmatpush3.bf16.msra.mxu0 %v565_v21  ;;  %766 = vmatprep.mubr.msk.bf16.mxu0 %vm819_vm0, %v818_v0 }
 0x4f7   : > { %767 = vmatmul.mubr.msk.bf16.vlgmr.msra.gmra.mrb[12].mxu0 %vm168_vm1, %v558_v25 }
 0x58d   : > { %v381_v26 = vpop.f32.mrb[4].mxu0 }
 0x58e   : > { %608 = vrot.lane.b32.xlu1 %v381_v26, %s831_s29  ;;  %v744_v27 = vpop.f32.mrb[5].mxu0 }
 0x58f   : > { %v384_v28 = vpop.f32.mrb[6].mxu0 }
 0x590   : > { %v745_v29 = vpop.f32.mrb[7].mxu0 }
 0x5c2   : > { %v491_v30 = vpop.f32.mrb[8].mxu0 }
 0x5c3   : > { %612 = vrot.lane.b32.xlu0 %v491_v30, %s832_s30  ;;  %v756_v31 = vpop.f32.mrb[9].mxu0 }
 0x5c4   : > { %v494_v32 = vpop.f32.mrb[10].mxu0 }
 0x5c5   : > { %v757_v33 = vpop.f32.mrb[11].mxu0 }
 0x5ca   : > { %v601_v35 = vpop.f32.mrb[12].mxu0 }
 0x5cb   : > { %616 = vrot.lane.b32.xlu1 %v601_v35, %s833_s3  ;;  %v768_v0 = vpop.f32.mrb[13].mxu0 }
 0x5cc   : > { %v604_v36 = vpop.f32.mrb[14].mxu0 }
 0x5cd   : > { %v769_v37 = vpop.f32.mrb[15].mxu0 }
 0x600   : > { %v609_v38 = vpop.permute.xlu1 %608 }
 0x601   : > { %v619_v40 = vsel %vm168_vm1, %v909_v34, %v609_v38 }
 0x635   : > { %v613_v39 = vpop.permute.xlu0 %612 }
 0x636   : > { %v621_v41 = vsel %vm620_vm3, %v619_v40, %v613_v39 }
 0x63d   : > { %v617_v42 = vpop.permute.xlu1 %616 }
 0x63e   : > { %v623_v43 = vsel %vm622_vm4, %v621_v41, %v617_v42 }
 0x63f   : > { %625 = vst.msk [vmem:[%s152_s6] sm:$0xff] %vm624_vm5, %v623_v43 }
 0x640 PF: > { %s12_s9 = sadd.s32 1, %s816_s9  }
 0x641   : > { %p9_p4 = scmp.ge.s32.totalorder %s12_s9, 4  }
 0x643   :  { %11 = sbr.rel (!%p9_p4) target bundleno = 1 (0x1), region = 61 }

// kernel: ie_mask_transformer_forward.23
= control target key start
LH: loop header
LB: loop body
LE: loop exit
PB: predicated region body
PF: predicated region fallthrough
CT: control target
= control target key end

     0   :  { %vm19_vm0 = vcmask 523264   ;;  %v118_v0 = vmov 0.0   ;;  %vm119_vm1 = vmmov 0   ;;  %vm33_vm2 = vcmask 261120   ;;  %s173_s1 = inlined_call_operand.vmem [shape: f32[32,64], index: 1, kind: input, shape index: {}]   ;;  %s174_s0 = inlined_call_operand.vmem [shape: f32[16,32], index: 0, kind: input, shape index: {}]   ;;  %s175_s2 = inlined_call_operand.vmem [shape: f32[1,64], index: 2, kind: input, shape index: {}]   ;;  %s176_s3 = inlined_call_operand.vmem [shape: f32[16,64], index: 3, kind: output, shape index: {}]  }
   0x1   :  { %108 = vmatprep.subr.bf16.mxu0 %v118_v0  ;;  %v27_v1 = vld [vmem:[%s173_s1] sm:$0xff]  ;;  %v28_v2 = vld [vmem:[%s173_s1 + $0x8] sm:$0xff]  ;;  %v29_v3 = vld [vmem:[%s173_s1 + $0x10] sm:$0xff]  ;;  %112 = vmatprep.mubr.msk.bf16.mxu0 %vm119_vm1, %v118_v0  ;;  %20 = vst.msk [vmem:[#allocation2] sm:$0xff] %vm19_vm0, %v118_v0 }
   0x2   :  { %21 = vst.msk [vmem:[#allocation2 + $0x8] sm:$0xff] %vm19_vm0, %v118_v0  ;;  %v31_v4 = vpack.c.bf16 %v28_v2, %v27_v1  ;;  %v30_v5 = vld [vmem:[%s173_s1 + $0x18] sm:$0xff]  ;;  %v24_v7 = vld [vmem:[%s174_s0] sm:$0xff]  ;;  %v25_v8 = vld [vmem:[%s174_s0 + $0x8] sm:$0xff] }
   0x3   :  { %v32_v6 = vpack.c.bf16 %v30_v5, %v29_v3  ;;  %v26_v9 = vpack.c.bf16 %v25_v8, %v24_v7  ;;  %v104_v18 = vld [vmem:[%s175_s2] ss:$0 sm:$0xff] }
   0x4   :  { %109 = vmatpush3.bf16.msra.mxu0 %v31_v4 }
   0x5   :  { %110 = vmatprep.subr.bf16.mxu0 %v118_v0 }
   0x8   :  { %111 = vmatpush3.bf16.msra.mxu0 %v32_v6  ;;  %v22_v10 = vld [vmem:[#allocation2] sm:$0xff] }
   0x9   :  { %v23_v12 = vld [vmem:[#allocation2 + $0x8] sm:$0xff] }
   0xb   :  { %113 = vmatmul.mubr.msk.bf16.vlgmr.msra.gmra.mrb[0].mxu0 %vm33_vm2, %v26_v9 }
  0xde   :  { %v71_v11 = vpop.f32.mrb[0].mxu0 }
  0xdf   :  { %v78_v13 = vadd.f32 %v71_v11, %v22_v10  ;;  %v114_v14 = vpop.f32.mrb[1].mxu0 }
  0xe0   :  { %v74_v15 = vpop.f32.mrb[2].mxu0 }
  0xe1   :  { %81 = vst.msk [vmem:[#allocation2] sm:$0xff] %vm19_vm0, %v78_v13  ;;  %v79_v16 = vadd.f32 %v74_v15, %v23_v12  ;;  %v115_v17 = vpop.f32.mrb[3].mxu0 }
  0xe3   :  { %82 = vst.msk [vmem:[#allocation2 + $0x8] sm:$0xff] %vm19_vm0, %v79_v16 }
  0xe8   :  { %v86_v19 = vld [vmem:[#allocation2] sm:$0xff] }
  0xe9   :  { %v95_v20 = vadd.f32 %v104_v18, %v86_v19 }
  0xea   :  { %v87_v21 = vld [vmem:[#allocation2 + $0x8] sm:$0xff] }
  0xeb   :  { %97 = vst.msk [vmem:[%s176_s3] sm:$0xff] %vm19_vm0, %v95_v20  ;;  %v96_v22 = vadd.f32 %v104_v18, %v87_v21 }
  0xed   :  { %98 = vst.msk [vmem:[%s176_s3 + $0x8] sm:$0xff] %vm19_vm0, %v96_v22 }

// kernel: ie_mask_transformer_forward.26
= control target key start
LH: loop header
LB: loop body
LE: loop exit
PB: predicated region body
PF: predicated region fallthrough
CT: control target
= control target key end

     0   :  { %v118_v0 = vmov 0.0   ;;  %vm119_vm0 = vmmov 0   ;;  %vm32_vm1 = vcmask 261120   ;;  %s167_s1 = inlined_call_operand.vmem [shape: f32[32,128], index: 1, kind: input, shape index: {}]   ;;  %s168_s0 = inlined_call_operand.vmem [shape: f32[16,32], index: 0, kind: input, shape index: {}]   ;;  %s169_s2 = inlined_call_operand.vmem [shape: f32[1,128], index: 2, kind: input, shape index: {}]   ;;  %s170_s3 = inlined_call_operand.vmem [shape: f32[16,128], index: 3, kind: output, shape index: {}]  }
   0x1   :  { %108 = vmatprep.subr.bf16.mxu0 %v118_v0  ;;  %v26_v1 = vld [vmem:[%s167_s1] sm:$0xff]  ;;  %v27_v2 = vld [vmem:[%s167_s1 + $0x8] sm:$0xff]  ;;  %v28_v3 = vld [vmem:[%s167_s1 + $0x10] sm:$0xff]  ;;  %112 = vmatprep.mubr.msk.bf16.mxu0 %vm119_vm0, %v118_v0 }
   0x2   :  { %v30_v4 = vpack.c.bf16 %v27_v2, %v26_v1  ;;  %v29_v5 = vld [vmem:[%s167_s1 + $0x18] sm:$0xff]  ;;  %v23_v7 = vld [vmem:[%s168_s0] sm:$0xff]  ;;  %v24_v8 = vld [vmem:[%s168_s0 + $0x8] sm:$0xff] }
   0x3   :  { %v31_v6 = vpack.c.bf16 %v29_v5, %v28_v3  ;;  %v25_v9 = vpack.c.bf16 %v24_v8, %v23_v7  ;;  %v104_v10 = vld [vmem:[%s169_s2] ss:$0 sm:$0xff] }
   0x4   :  { %109 = vmatpush3.bf16.msra.mxu0 %v30_v4 }
   0x5   :  { %110 = vmatprep.subr.bf16.mxu0 %v118_v0 }
   0x8   :  { %111 = vmatpush3.bf16.msra.mxu0 %v31_v6 }
   0xb   :  { %113 = vmatmul.mubr.msk.bf16.vlgmr.msra.gmra.mrb[0].mxu0 %vm32_vm1, %v25_v9 }
  0xde   :  { %v70_v11 = vpop.f32.mrb[0].mxu0 }
  0xdf   :  { %v93_v12 = vadd.f32 %v104_v10, %v70_v11  ;;  %v114_v13 = vpop.f32.mrb[1].mxu0 }
  0xe0   :  { %v73_v14 = vpop.f32.mrb[2].mxu0 }
  0xe1   :  { %v95_v15 = vmax.f32 %v93_v12, 0.0  ;;  %v94_v16 = vadd.f32 %v104_v10, %v73_v14  ;;  %v115_v17 = vpop.f32.mrb[3].mxu0 }
  0xe3   :  { %97 = vst [vmem:[%s170_s3] sm:$0xff] %v95_v15  ;;  %v96_v18 = vmax.f32 %v94_v16, 0.0 }
  0xe5   :  { %98 = vst [vmem:[%s170_s3 + $0x8] sm:$0xff] %v96_v18 }

// kernel: ie_mask_transformer_forward.24
= control target key start
LH: loop header
LB: loop body
LE: loop exit
PB: predicated region body
PF: predicated region fallthrough
CT: control target
= control target key end

     0   :  { %s902_s12 = smov 0   ;;  %s998_s0 = inlined_call_operand.vmem [shape: f32[2,8,32], index: 0, kind: input, shape index: {}]   ;;  %s999_s1 = inlined_call_operand.vmem [shape: f32[2,8,64], index: 1, kind: input, shape index: {}]   ;;  %s1000_s2 = inlined_call_operand.vmem [shape: f32[2,1,8], index: 2, kind: input, shape index: {}]   ;;  %s1001_s3 = inlined_call_operand.vmem [shape: f32[2,8,32], index: 3, kind: output, shape index: {}]  }
   0x1 LB: > { %s743_s13 = sadd.s32 4294967295, %s868_s12   ;;  %p747_p0 = scmp.ge.s32.totalorder %s868_s12, 1  ;;  %s868_s12 = sphi %s902_s12, %s13_s12  }
   0x2   : > { %p153_p1 = scmp.lt.s32.totalorder %s868_s12, 3 }
   0x4   : > { %p154_p2 = pnand %p747_p0, %p153_p1 }
   0x5   : > { %p182_p3 = scmp.lt.s32.totalorder (!%p154_p2), %s743_s13, 1  ;;  %v870_v0 = vmov (!%p154_p2), 0.0   ;;  %vm871_vm0 = vmmov (!%p154_p2), 0   ;;  %vm210_vm1 = vcmask (!%p154_p2), 64512   ;;  %s872_s24 = smov (!%p154_p2), 96   ;;  %vm275_vm2 = vcmask (!%p154_p2), 1043456  }
   0x6   : > { %157 = sbr.rel (%p154_p2) target bundleno = 1441 (0x5a1), region = 32  ;;  %778 = vmatprep.subr.bf16.mxu0 (!%p154_p2), %v870_v0  ;;  %780 = vmatprep.mubr.msk.bf16.mxu0 (!%p154_p2), %vm871_vm0, %v870_v0  ;;  %s873_s25 = smov (!%p154_p2), 120   ;;  %vm663_vm3 = vcmask (!%p154_p2), 130048   ;;  %vm665_vm4 = vcmask (!%p154_p2), 195584   ;;  %vm667_vm5 = vcmask (!%p154_p2), 261120  }
   0x7   : > { %784 = vmatprep.subr.bf16.mxu1 (!%p154_p2), %v870_v0  ;;  %786 = vmatprep.mubr.msk.bf16.mxu1 (!%p154_p2), %vm871_vm0, %v870_v0  ;;  %s874_s26 = smov (!%p154_p2), 112   ;;  %s875_s27 = smov (!%p154_p2), 104  }
   0x8   : > { %s876_s28 = smov (!%p154_p2), 88   ;;  %s877_s29 = smov (!%p154_p2), 72  }
   0x9   : > { %s878_s30 = smov (!%p154_p2), 80   ;;  %s879_s4 = smov (!%p154_p2), 8  }
   0xa   : > { %s880_s5 = smov (!%p154_p2), 16   ;;  %s881_s6 = smov (!%p154_p2), 24  }
   0xd   : > { %s1003_s13 = smov (!%p182_p3, %s743_s13), 1 }
   0xe   : > { %s916_s14 = sshll.u32 %s1003_s13, 3  ;;  %s192_s23 = scalar_lea.vmem %s1000_s2, %s1003_s13 }
   0xf   : > { %s189_s17 = scalar_lea.vmem %s999_s1, %s916_s14  ;;  %s185_s20 = scalar_lea.vmem %s998_s0, %s916_s14  ;;  %v937_v7 = vld [vmem:[%s192_s23] ss:$0 sm:$0xff] }
  0x10   : > { %v198_v1 = vld [vmem:[%s189_s17] sm:$0xff]  ;;  %s196_s9 = scalar_lea.vmem %s1001_s3, %s916_s14 }
  0x11   : > { %v199_v2 = vld [vmem:[%s185_s20] sm:$0xff]  ;;  %v926_v3 = vpack.c.bf16 %v198_v1, %v198_v1 }
  0x12   : > { %v201_v5 = vmul.f32 0.35355338, %v199_v2 }
  0x13   : > { %v215_v4 = vsel %vm210_vm1, %v926_v3, 0  ;;  %270 = vrot.lane.b32.xlu1 %v926_v3, %s872_s24 }
  0x14   : > { %779 = vmatpush3.bf16.xpose.msra.mxu0 %v215_v4  ;;  %v202_v6 = vpack.c.bf16 %v201_v5, %v201_v5 }
  0x15   : > { %796 = vmatprep.subr.bf16.mxu0 %v870_v0 }
  0x17   : > { %322 = vrot.lane.b32.xlu1 %v926_v3, %s873_s25 }
  0x1b   : > { %781 = vmatmul.mubr.msk.bf16.vlgmr.msra.gmra.mrb[0].mxu0 %vm210_vm1, %v202_v6  ;;  %432 = vrot.lane.b32.xlu1 %v926_v3, %s874_s26 }
  0x1c   : > { %798 = vmatprep.mubr.msk.bf16.mxu0 %vm871_vm0, %v870_v0 }
  0x1f   : > { %430 = vrot.lane.b32.xlu1 %v202_v6, %s874_s26 }
  0x23   : > { %542 = vrot.lane.b32.xlu1 %v926_v3, %s875_s27 }
  0x27   : > { %540 = vrot.lane.b32.xlu1 %v202_v6, %s875_s27 }
  0x85   : > { %v271_v19 = vpop.permute.xlu1 %270 }
  0x86   : > { %v277_v20 = vsel %vm275_vm2, %v271_v19, 0 }
  0x87   : > { %785 = vmatpush3.bf16.msra.mxu1 %v277_v20 }
  0x88   : > { %790 = vmatprep.subr.bf16.mxu1 %v870_v0 }
  0x89   : > { %v323_v23 = vpop.permute.xlu1 %322 }
  0x8a   : > { %v328_v25 = vsel %vm210_vm1, %v323_v23, 0 }
  0x8d   : > { %v433_v27 = vpop.permute.xlu1 %432 }
  0x8e   : > { %v438_v30 = vsel %vm210_vm1, %v433_v27, 0 }
  0x91   : > { %v431_v29 = vpop.permute.xlu1 %430 }
  0x95   : > { %v543_v31 = vpop.permute.xlu1 %542 }
  0x96   : > { %v548_v32 = vsel %vm210_vm1, %v543_v31, 0 }
  0x99   : > { %v541_v33 = vpop.permute.xlu1 %540 }
  0xee   : > { %v251_v8 = vpop.f32.mrb[0].mxu0 }
  0xef   : > { %v252_v9 = vadd.f32 %v937_v7, %v251_v8  ;;  %v782_v10 = vpop.f32.mrb[1].mxu0 }
  0xf0   : > { %v254_v11 = vpop.f32.mrb[2].mxu0 }
  0xf1   : > { %v783_v12 = vpop.f32.mrb[3].mxu0  ;;  %v257_v13 = vsel %vm210_vm1, %v252_v9, -inf }
  0xf2   : > { %258 = vmax.xlane.f32.xlu0 %v257_v13 }
 0x17f   : > { %v259_v14 = vpop.xlane.xlu0 %258 }
 0x180   : > { %v260_v15 = vsub.f32 %v252_v9, %v259_v14 }
 0x182   : > { %v261_v16 = vmul.f32 1.442695, %v260_v15 }
 0x184   : > { %846 = vpow2.f32 %v261_v16 }
 0x18e   : > { %v847_v17 = vpop.eup %846 }
 0x18f   : > { %v263_v18 = vsel %vm210_vm1, %v847_v17, 0.0 }
 0x190   : > { %264 = vadd.xlane.f32.xlu0 %v263_v18 }
 0x1a6   : > { %320 = vrot.lane.b32.xlu0 %v202_v6, %s873_s25 }
 0x21d   : > { %v265_v21 = vpop.xlane.xlu0 %264 }
 0x21e   : > { %848 = vrcp.f32 %v265_v21 }
 0x221   : > { %v321_v28 = vpop.permute.xlu0 %320 }
 0x228   : > { %v849_v22 = vpop.eup %848 }
 0x229   : > { %v267_v24 = vmul.f32 %v849_v22, %v847_v17 }
 0x22b   : > { %v268_v26 = vpack.c.bf16 %v267_v24, %v267_v24 }
 0x22d   : > { %787 = vmatmul.mubr.msk.bf16.vlgmr.msra.gmra.mrb[0].mxu1 %vm210_vm1, %v268_v26 }
 0x22e   : > { %791 = vmatpush3.bf16.xpose.msra.mxu1 %v328_v25  ;;  %792 = vmatprep.mubr.msk.bf16.mxu1 %vm871_vm0, %v870_v0 }
 0x22f   : > { %802 = vmatprep.subr.bf16.mxu1 %v870_v0 }
 0x235   : > { %793 = vmatmul.mubr.msk.bf16.vlgmr.msra.gmra.mrb[4].mxu1 %vm210_vm1, %v321_v28 }
 0x236   : > { %803 = vmatpush3.bf16.xpose.msra.mxu1 %v438_v30  ;;  %804 = vmatprep.mubr.msk.bf16.mxu1 %vm871_vm0, %v870_v0 }
 0x237   : > { %814 = vmatprep.subr.bf16.mxu1 %v870_v0 }
 0x23d   : > { %805 = vmatmul.mubr.msk.bf16.vlgmr.msra.gmra.mrb[8].mxu1 %vm210_vm1, %v431_v29 }
 0x23e   : > { %815 = vmatpush3.bf16.xpose.msra.mxu1 %v548_v32  ;;  %816 = vmatprep.mubr.msk.bf16.mxu1 %vm871_vm0, %v870_v0 }
 0x245   : > { %817 = vmatmul.mubr.msk.bf16.vlgmr.msra.gmra.mrb[12].mxu1 %vm210_vm1, %v541_v33 }
 0x300   : > { %v963_v34 = vpop.f32.mrb[0].mxu1 }
 0x301   : > { %v788_v35 = vpop.f32.mrb[1].mxu1 }
 0x302   : > { %v316_v36 = vpop.f32.mrb[2].mxu1 }
 0x303   : > { %v789_v37 = vpop.f32.mrb[3].mxu1 }
 0x308   : > { %v364_v38 = vpop.f32.mrb[4].mxu1 }
 0x309   : > { %v365_v39 = vadd.f32 %v937_v7, %v364_v38  ;;  %v794_v40 = vpop.f32.mrb[5].mxu1 }
 0x30a   : > { %v367_v41 = vpop.f32.mrb[6].mxu1 }
 0x30b   : > { %v795_v42 = vpop.f32.mrb[7].mxu1  ;;  %v370_v43 = vsel %vm210_vm1, %v365_v39, -inf }
 0x30c   : > { %371 = vmax.xlane.f32.xlu1 %v370_v43 }
 0x310   : > { %v474_v44 = vpop.f32.mrb[8].mxu1 }
 0x311   : > { %v475_v45 = vadd.f32 %v937_v7, %v474_v44  ;;  %v806_v46 = vpop.f32.mrb[9].mxu1 }
 0x312   : > { %v477_v47 = vpop.f32.mrb[10].mxu1 }
 0x313   : > { %v807_v48 = vpop.f32.mrb[11].mxu1  ;;  %v480_v49 = vsel %vm210_vm1, %v475_v45, -inf }
 0x314   : > { %481 = vmax.xlane.f32.xlu0 %v480_v49 }
 0x318   : > { %v584_v50 = vpop.f32.mrb[12].mxu1 }
 0x319   : > { %v585_v51 = vadd.f32 %v937_v7, %v584_v50  ;;  %v818_v52 = vpop.f32.mrb[13].mxu1 }
 0x31a   : > { %v587_v53 = vpop.f32.mrb[14].mxu1 }
 0x31b   : > { %v819_v54 = vpop.f32.mrb[15].mxu1  ;;  %v590_v55 = vsel %vm210_vm1, %v585_v51, -inf }
 0x31c   : > { %591 = vmax.xlane.f32.xlu1 %v590_v55 }
 0x32d   : > { %382 = vrot.lane.b32.xlu1 %v926_v3, %s876_s28 }
 0x399   : > { %v372_v56 = vpop.xlane.xlu1 %371 }
 0x39a   : > { %v373_v57 = vsub.f32 %v365_v39, %v372_v56 }
 0x39c   : > { %v374_v58 = vmul.f32 1.442695, %v373_v57 }
 0x39e   : > { %850 = vpow2.f32 %v374_v58 }
 0x3a1   : > { %v482_v59 = vpop.xlane.xlu0 %481 }
 0x3a2   : > { %v483_v60 = vsub.f32 %v475_v45, %v482_v59 }
 0x3a4   : > { %v484_v61 = vmul.f32 1.442695, %v483_v60 }
 0x3a6   : > { %852 = vpow2.f32 %v484_v61 }
 0x3a8   : > { %v851_v62 = vpop.eup %850 }
 0x3a9   : > { %v592_v63 = vpop.xlane.xlu1 %591  ;;  %v376_v1 = vsel %vm210_vm1, %v851_v62, 0.0 }
 0x3aa   : > { %v593_v2 = vsub.f32 %v585_v51, %v592_v63  ;;  %377 = vadd.xlane.f32.xlu0 %v376_v1 }
 0x3ac   : > { %v594_v4 = vmul.f32 1.442695, %v593_v2 }
 0x3ad   : > { %v383_v5 = vpop.permute.xlu1 %382 }
 0x3ae   : > { %854 = vpow2.f32 %v594_v4  ;;  %v388_v6 = vsel %vm275_vm2, %v383_v5, 0 }
 0x3af   : > { %797 = vmatpush3.bf16.msra.mxu0 %v388_v6 }
 0x3b0   : > { %v853_v7 = vpop.eup %852  ;;  %808 = vmatprep.subr.bf16.mxu0 %v870_v0 }
 0x3b1   : > { %v486_v8 = vsel %vm210_vm1, %v853_v7, 0.0 }
 0x3b2   : > { %487 = vadd.xlane.f32.xlu1 %v486_v8 }
 0x3b8   : > { %v855_v9 = vpop.eup %854 }
 0x3b9   : > { %v596_v10 = vsel %vm210_vm1, %v855_v9, 0.0 }
 0x3ba   : > { %597 = vadd.xlane.f32.xlu0 %v596_v10 }
 0x3c3   : > { %602 = vrot.lane.b32.xlu1 %v926_v3, %s877_s29 }
 0x3d0   : > { %492 = vrot.lane.b32.xlu0 %v926_v3, %s878_s30 }
 0x437   : > { %v378_v11 = vpop.xlane.xlu0 %377 }
 0x438   : > { %856 = vrcp.f32 %v378_v11 }
 0x43f   : > { %v488_v12 = vpop.xlane.xlu1 %487 }
 0x440   : > { %858 = vrcp.f32 %v488_v12 }
 0x442   : > { %v857_v13 = vpop.eup %856 }
 0x443   : > { %v380_v14 = vmul.f32 %v857_v13, %v851_v62  ;;  %v603_v20 = vpop.permute.xlu1 %602 }
 0x444   : > { %v608_v22 = vsel %vm275_vm2, %v603_v20, 0 }
 0x445   : > { %v381_v15 = vpack.c.bf16 %v380_v14, %v380_v14 }
 0x447   : > { %v598_v16 = vpop.xlane.xlu0 %597  ;;  %799 = vmatmul.mubr.msk.bf16.vlgmr.msra.gmra.mrb[4].mxu0 %vm210_vm1, %v381_v15 }
 0x448   : > { %860 = vrcp.f32 %v598_v16  ;;  %810 = vmatprep.mubr.msk.bf16.mxu0 %vm871_vm0, %v870_v0 }
 0x44a   : > { %v859_v17 = vpop.eup %858 }
 0x44b   : > { %v490_v18 = vmul.f32 %v859_v17, %v853_v7  ;;  %v493_v19 = vpop.permute.xlu0 %492 }
 0x44c   : > { %v498_v3 = vsel %vm275_vm2, %v493_v19, 0 }
 0x44d   : > { %809 = vmatpush3.bf16.msra.mxu0 %v498_v3  ;;  %v491_v21 = vpack.c.bf16 %v490_v18, %v490_v18 }
 0x44e   : > { %820 = vmatprep.subr.bf16.mxu0 %v870_v0 }
 0x450   : > { %811 = vmatmul.mubr.msk.bf16.vlgmr.msra.gmra.mrb[8].mxu0 %vm210_vm1, %v491_v21 }
 0x451   : > { %821 = vmatpush3.bf16.msra.mxu0 %v608_v22  ;;  %822 = vmatprep.mubr.msk.bf16.mxu0 %vm871_vm0, %v870_v0 }
 0x452   : > { %v861_v23 = vpop.eup %860 }
 0x453   : > { %v600_v24 = vmul.f32 %v861_v23, %v855_v9 }
 0x455   : > { %v601_v25 = vpack.c.bf16 %v600_v24, %v600_v24 }
 0x458   : > { %823 = vmatmul.mubr.msk.bf16.vlgmr.msra.gmra.mrb[12].mxu0 %vm210_vm1, %v601_v25 }
 0x51a   : > { %v424_v26 = vpop.f32.mrb[4].mxu0 }
 0x51b   : > { %651 = vrot.lane.b32.xlu1 %v424_v26, %s879_s4  ;;  %v800_v27 = vpop.f32.mrb[5].mxu0 }
 0x51c   : > { %v427_v28 = vpop.f32.mrb[6].mxu0 }
 0x51d   : > { %v801_v29 = vpop.f32.mrb[7].mxu0 }
 0x523   : > { %v534_v30 = vpop.f32.mrb[8].mxu0 }
 0x524   : > { %655 = vrot.lane.b32.xlu0 %v534_v30, %s880_s5  ;;  %v812_v31 = vpop.f32.mrb[9].mxu0 }
 0x525   : > { %v537_v32 = vpop.f32.mrb[10].mxu0 }
 0x526   : > { %v813_v33 = vpop.f32.mrb[11].mxu0 }
 0x52b   : > { %v644_v35 = vpop.f32.mrb[12].mxu0 }
 0x52c   : > { %659 = vrot.lane.b32.xlu1 %v644_v35, %s881_s6  ;;  %v824_v0 = vpop.f32.mrb[13].mxu0 }
 0x52d   : > { %v647_v36 = vpop.f32.mrb[14].mxu0 }
 0x52e   : > { %v825_v37 = vpop.f32.mrb[15].mxu0 }
 0x58d   : > { %v652_v38 = vpop.permute.xlu1 %651 }
 0x58e   : > { %v662_v40 = vsel %vm210_vm1, %v963_v34, %v652_v38 }
 0x596   : > { %v656_v39 = vpop.permute.xlu0 %655 }
 0x597   : > { %v664_v41 = vsel %vm663_vm3, %v662_v40, %v656_v39 }
 0x59e   : > { %v660_v42 = vpop.permute.xlu1 %659 }
 0x59f   : > { %v666_v43 = vsel %vm665_vm4, %v664_v41, %v660_v42 }
 0x5a0   : > { %668 = vst.msk [vmem:[%s196_s9] sm:$0xff] %vm667_vm5, %v666_v43 }
 0x5a1 PF: > { %s13_s12 = sadd.s32 1, %s868_s12  }
 0x5a2   : > { %p10_p4 = scmp.ge.s32.totalorder %s13_s12, 4  }
 0x5a4   :  { %12 = sbr.rel (!%p10_p4) target bundleno = 1 (0x1), region = 68 }

// kernel: ie_mask_transformer_forward.27
= control target key start
LH: loop header
LB: loop body
LE: loop exit
PB: predicated region body
PF: predicated region fallthrough
CT: control target
= control target key end

     0   :  { %vm28_vm0 = vcmask 261120   ;;  %v213_v0 = vmov 0.0   ;;  %vm214_vm1 = vmmov 0   ;;  %s335_s1 = inlined_call_operand.vmem [shape: f32[128,32], index: 1, kind: input, shape index: {}]   ;;  %s336_s0 = inlined_call_operand.vmem [shape: f32[16,128], index: 0, kind: input, shape index: {}]   ;;  %s337_s2 = inlined_call_operand.vmem [shape: f32[1,32], index: 2, kind: input, shape index: {}]   ;;  %s338_s3 = inlined_call_operand.vmem [shape: f32[16,32], index: 3, kind: input, shape index: {}]   ;;  %s339_s4 = inlined_call_operand.vmem [shape: f32[1,32], index: 4, kind: input, shape index: {}]   ;;  %s340_s5 = inlined_call_operand.vmem [shape: f32[1,32], index: 5, kind: input, shape index: {}]   ;;  %s341_s6 = inlined_call_operand.vmem [shape: f32[16,32], index: 6, kind: output, shape index: {}]  }
   0x1   :  { %187 = vmatprep.subr.bf16.mxu0 %v213_v0  ;;  %v36_v1 = vld [vmem:[%s335_s1] sm:$0xff]  ;;  %v37_v2 = vld [vmem:[%s335_s1 + $0x8] sm:$0xff]  ;;  %v38_v3 = vld [vmem:[%s335_s1 + $0x10] sm:$0xff]  ;;  %203 = vmatprep.mubr.msk.bf16.mxu0 %vm214_vm1, %v213_v0  ;;  %29 = vst.msk [vmem:[#allocation2] sm:$0xff] %vm28_vm0, %v213_v0 }
   0x2   :  { %30 = vst.msk [vmem:[#allocation2 + $0x8] sm:$0xff] %vm28_vm0, %v213_v0  ;;  %v52_v4 = vpack.c.bf16 %v37_v2, %v36_v1  ;;  %v39_v5 = vld [vmem:[%s335_s1 + $0x18] sm:$0xff]  ;;  %v40_v7 = vld [vmem:[%s335_s1 + $0x20] sm:$0xff]  ;;  %v41_v8 = vld [vmem:[%s335_s1 + $0x28] sm:$0xff] }
   0x3   :  { %v53_v6 = vpack.c.bf16 %v39_v5, %v38_v3  ;;  %v54_v9 = vpack.c.bf16 %v41_v8, %v40_v7  ;;  %v42_v10 = vld [vmem:[%s335_s1 + $0x30] sm:$0xff]  ;;  %v43_v11 = vld [vmem:[%s335_s1 + $0x38] sm:$0xff]  ;;  %v44_v13 = vld [vmem:[%s335_s1 + $0x40] sm:$0xff] }
   0x4   :  { %188 = vmatpush3.bf16.msra.mxu0 %v52_v4  ;;  %v55_v12 = vpack.c.bf16 %v43_v11, %v42_v10  ;;  %v45_v14 = vld [vmem:[%s335_s1 + $0x48] sm:$0xff]  ;;  %v46_v16 = vld [vmem:[%s335_s1 + $0x50] sm:$0xff]  ;;  %v47_v17 = vld [vmem:[%s335_s1 + $0x58] sm:$0xff] }
   0x5   :  { %189 = vmatprep.subr.bf16.mxu0 %v213_v0  ;;  %v56_v15 = vpack.c.bf16 %v45_v14, %v44_v13  ;;  %v57_v18 = vpack.c.bf16 %v47_v17, %v46_v16  ;;  %v48_v19 = vld [vmem:[%s335_s1 + $0x60] sm:$0xff]  ;;  %v49_v20 = vld [vmem:[%s335_s1 + $0x68] sm:$0xff]  ;;  %v50_v22 = vld [vmem:[%s335_s1 + $0x70] sm:$0xff] }
   0x6   :  { %v58_v21 = vpack.c.bf16 %v49_v20, %v48_v19  ;;  %v51_v23 = vld [vmem:[%s335_s1 + $0x78] sm:$0xff]  ;;  %v33_v25 = vld [vmem:[%s336_s0] sm:$0xff]  ;;  %v34_v26 = vld [vmem:[%s336_s0 + $0x8] sm:$0xff] }
   0x7   :  { %v59_v24 = vpack.c.bf16 %v51_v23, %v50_v22  ;;  %v35_v27 = vpack.c.bf16 %v34_v26, %v33_v25  ;;  %v175_v36 = vld [vmem:[%s337_s2] ss:$0 sm:$0xff]  ;;  %v121_v41 = vld [vmem:[%s338_s3 + $0x8] sm:$0xff] }
   0x8   :  { %190 = vmatpush3.bf16.msra.mxu0 %v53_v6  ;;  %v31_v28 = vld [vmem:[#allocation2] sm:$0xff] }
   0x9   :  { %191 = vmatprep.subr.bf16.mxu0 %v213_v0  ;;  %v32_v30 = vld [vmem:[#allocation2 + $0x8] sm:$0xff]  ;;  %v120_v38 = vld [vmem:[%s338_s3] sm:$0xff] }
   0xa   :  { %v177_v2 = vld [vmem:[%s340_s5] ss:$0 sm:$0xff] }
   0xc   :  { %192 = vmatpush3.bf16.msra.mxu0 %v54_v9 }
   0xd   :  { %193 = vmatprep.subr.bf16.mxu0 %v213_v0 }
  0x10   :  { %194 = vmatpush3.bf16.msra.mxu0 %v55_v12 }
  0x11   :  { %195 = vmatprep.subr.bf16.mxu0 %v213_v0 }
  0x14   :  { %196 = vmatpush3.bf16.msra.mxu0 %v56_v15 }
  0x15   :  { %197 = vmatprep.subr.bf16.mxu0 %v213_v0 }
  0x18   :  { %198 = vmatpush3.bf16.msra.mxu0 %v57_v18 }
  0x19   :  { %199 = vmatprep.subr.bf16.mxu0 %v213_v0 }
  0x1c   :  { %200 = vmatpush3.bf16.msra.mxu0 %v58_v21 }
  0x1d   :  { %201 = vmatprep.subr.bf16.mxu0 %v213_v0  ;;  %v176_v0 = vld [vmem:[%s339_s4] ss:$0 sm:$0xff] }
  0x20   :  { %202 = vmatpush3.bf16.msra.mxu0 %v59_v24 }
  0x23   :  { %204 = vmatmul.mubr.bf16.vlgmr.msra.gmra.mrb[0].mxu0 %v35_v27 }
  0xf6   :  { %v94_v29 = vpop.f32.mrb[0].mxu0 }
  0xf7   :  { %v101_v31 = vadd.f32 %v94_v29, %v31_v28  ;;  %v205_v32 = vpop.f32.mrb[1].mxu0 }
  0xf8   :  { %v97_v33 = vpop.f32.mrb[2].mxu0 }
  0xf9   :  { %104 = vst.msk [vmem:[#allocation2] sm:$0xff] %vm28_vm0, %v101_v31  ;;  %v102_v34 = vadd.f32 %v97_v33, %v32_v30  ;;  %v206_v35 = vpop.f32.mrb[3].mxu0 }
  0xfb   :  { %105 = vst.msk [vmem:[#allocation2 + $0x8] sm:$0xff] %vm28_vm0, %v102_v34 }
 0x100   :  { %v109_v37 = vld [vmem:[#allocation2] sm:$0xff] }
 0x101   :  { %v118_v39 = vadd.f32 %v175_v36, %v109_v37 }
 0x102   :  { %v110_v40 = vld [vmem:[#allocation2 + $0x8] sm:$0xff] }
 0x103   :  { %v122_v42 = vadd.f32 %v120_v38, %v118_v39  ;;  %v119_v43 = vadd.f32 %v175_v36, %v110_v40 }
 0x105   :  { %v124_v44 = vsel %vm28_vm0, %v122_v42, 0.0  ;;  %v123_v45 = vadd.f32 %v121_v41, %v119_v43 }
 0x106   :  { %125 = vadd.xlane.f32.xlu0 %v124_v44 }
 0x107   :  { %v127_v46 = vsel %vm28_vm0, %v123_v45, 0.0 }
 0x10a   :  { %128 = vadd.xlane.f32.xlu0 %v127_v46 }
 0x193   :  { %v126_v47 = vpop.xlane.xlu0 %125 }
 0x194   :  { %v131_v48 = vmul.f32 0.03125, %v126_v47 }
 0x196   :  { %v133_v49 = vsub.f32 %v122_v42, %v131_v48 }
 0x197   :  { %v129_v50 = vpop.xlane.xlu0 %128 }
 0x198   :  { %v132_v51 = vmul.f32 0.03125, %v129_v50  ;;  %v135_v52 = vmul.f32 %v133_v49, %v133_v49 }
 0x19a   :  { %v134_v53 = vsub.f32 %v123_v45, %v132_v51  ;;  %v137_v54 = vsel %vm28_vm0, %v135_v52, 0.0 }
 0x19b   :  { %138 = vadd.xlane.f32.xlu1 %v137_v54 }
 0x19c   :  { %v136_v55 = vmul.f32 %v134_v53, %v134_v53 }
 0x19e   :  { %v140_v56 = vsel %vm28_vm0, %v136_v55, 0.0 }
 0x19f   :  { %141 = vadd.xlane.f32.xlu1 %v140_v56 }
 0x228   :  { %v139_v57 = vpop.xlane.xlu1 %138 }
 0x229   :  { %v143_v58 = vmul.f32 0.03125, %v139_v57 }
 0x22b   :  { %v145_v59 = vadd.f32 1e-05, %v143_v58 }
 0x22c   :  { %v142_v60 = vpop.xlane.xlu1 %141 }
 0x22d   :  { %209 = vrsqrt.f32 %v145_v59  ;;  %v144_v61 = vmul.f32 0.03125, %v142_v60 }
 0x22f   :  { %v146_v62 = vadd.f32 1e-05, %v144_v61 }
 0x231   :  { %211 = vrsqrt.f32 %v146_v62 }
 0x237   :  { %v210_v63 = vpop.eup %209 }
 0x238   :  { %v149_v1 = vmul.f32 %v210_v63, %v133_v49 }
 0x23a   :  { %v158_v3 = vmul.f32 %v176_v0, %v149_v1 }
 0x23b   :  { %v212_v4 = vpop.eup %211 }
 0x23c   :  { %v167_v5 = vadd.f32 %v177_v2, %v158_v3  ;;  %v150_v6 = vmul.f32 %v212_v4, %v134_v53 }
 0x23e   :  { %169 = vst.msk [vmem:[%s341_s6] sm:$0xff] %vm28_vm0, %v167_v5  ;;  %v159_v7 = vmul.f32 %v176_v0, %v150_v6 }
 0x240   :  { %v168_v8 = vadd.f32 %v177_v2, %v159_v7 }
 0x242   :  { %170 = vst.msk [vmem:[%s341_s6 + $0x8] sm:$0xff] %vm28_vm0, %v168_v8 }

// kernel: ie_mask_transformer_forward.37
= control target key start
LH: loop header
LB: loop body
LE: loop exit
PB: predicated region body
PF: predicated region fallthrough
CT: control target
= control target key end

     0   :  { %v158_v3 = vmov 0.0   ;;  %vm159_vm0 = vmmov 0   ;;  %vm20_vm1 = vcmask 130048   ;;  %s222_s0 = inlined_call_operand.vmem [shape: f32[16,32], index: 0, kind: input, shape index: {}]   ;;  %s223_s1 = inlined_call_operand.vmem [shape: f32[32,16], index: 1, kind: input, shape index: {}]   ;;  %s224_s2 = inlined_call_operand.vmem [shape: f32[1,16], index: 2, kind: input, shape index: {}]   ;;  %s225_s3 = inlined_call_operand.hbm [shape: f32[16,16], index: 3, kind: output, shape index: {}]  }
   0x1   :  { %v28_v0 = vld [vmem:[%s223_s1] sm:$0xff]  ;;  %v29_v1 = vld [vmem:[%s223_s1 + $0x8] sm:$0xff]  ;;  %v30_v2 = vld [vmem:[%s223_s1 + $0x10] sm:$0xff]  ;;  %121 = vmatprep.subr.bf16.mxu0 %v158_v3  ;;  %125 = vmatprep.mubr.msk.bf16.mxu0 %vm159_vm0, %v158_v3  ;;  %21 = vst.msk [vmem:[#allocation2] sm:$0xff] %vm20_vm1, %v158_v3 }
   0x2   :  { %v32_v4 = vpack.c.bf16 %v29_v1, %v28_v0  ;;  %v31_v5 = vld [vmem:[%s223_s1 + $0x18] sm:$0xff]  ;;  %22 = vst.msk [vmem:[#allocation2 + $0x8] sm:$0xff] %vm20_vm1, %v158_v3 }
   0x3   :  { %8 = vsyncpa [#allocation4], 0  ;;  %v33_v6 = vpack.c.bf16 %v31_v5, %v30_v2  ;;  %v25_v7 = vld [vmem:[%s222_s0] sm:$0xff]  ;;  %v26_v8 = vld [vmem:[%s222_s0 + $0x8] sm:$0xff]  ;;  %vm34_vm2 = vcmask 261120   ;;  %s160_s0 = smov [#allocation3]  }
   0x4   :  { %122 = vmatpush3.bf16.msra.mxu0 %v32_v4  ;;  %v27_v9 = vpack.c.bf16 %v26_v8, %v25_v7  ;;  %v117_v18 = vld [vmem:[%s224_s2] ss:$0 sm:$0xff]  ;;  %s105_s25 = sshll.u32 %s160_s0, 4  ;;  %s106_s25 = int_to_ptr.vmem [resolvable:$true] %s105_s25 }
   0x5   :  { %123 = vmatprep.subr.bf16.mxu0 %v158_v3  ;;  %s134_s26 = scalar_lea.vmem %s106_s25, 256  ;;  %p139_p1 = scmp.lt.s32.totalorder %s106_s25, %s106_s25 }
   0x6   :  { %p135_p0 = scmp.ne.s32.totalorder %s106_s25, %s134_s26  ;;  %p140_p2 = scmp.lt.s32.totalorder %s134_s26, %s134_s26 }
   0x8   :  { %124 = vmatpush3.bf16.msra.mxu0 %v33_v6  ;;  %v23_v10 = vld [vmem:[#allocation2] sm:$0xff]  ;;  %p141_p3 = por %p140_p2, %p139_p1 }
   0x9   :  { %v24_v12 = vld [vmem:[#allocation2 + $0x8] sm:$0xff] }
   0xa   :  { %p142_p4 = pnand %p141_p3, %p135_p0 }
   0xb   :  { %126 = vmatmul.mubr.msk.bf16.vlgmr.msra.gmra.mrb[0].mxu0 %vm34_vm2, %v27_v9 }
  0xde   :  { %v72_v11 = vpop.f32.mrb[0].mxu0 }
  0xdf   :  { %v79_v13 = vadd.f32 %v72_v11, %v23_v10  ;;  %v127_v14 = vpop.f32.mrb[1].mxu0 }
  0xe0   :  { %v75_v15 = vpop.f32.mrb[2].mxu0 }
  0xe1   :  { %82 = vst.msk [vmem:[#allocation2] sm:$0xff] %vm20_vm1, %v79_v13  ;;  %v80_v16 = vadd.f32 %v75_v15, %v24_v12  ;;  %v128_v17 = vpop.f32.mrb[3].mxu0 }
  0xe3   :  { %83 = vst.msk [vmem:[#allocation2 + $0x8] sm:$0xff] %vm20_vm1, %v80_v16 }
  0xe8   :  { %v87_v19 = vld [vmem:[#allocation2] sm:$0xff] }
  0xe9   :  { %v96_v20 = vadd.f32 %v117_v18, %v87_v19 }
  0xea   :  { %v88_v21 = vld [vmem:[#allocation2 + $0x8] sm:$0xff] }
  0xeb   :  { %v97_v22 = vadd.f32 %v117_v18, %v88_v21  ;;  %98 = vst.msk [vmem:[#allocation3] sm:$0xff] %vm20_vm1, %v96_v20 }
  0xed   :  { %99 = vst.msk [vmem:[#allocation3 + $0x8] sm:$0xff] %vm20_vm1, %v97_v22 }
  0xee   :  { %145 = shalt.err (!%p142_p4)
}
  0xef   :  { %s146_s28 = scalar_lea.hbm %s225_s3, 256 }
  0xf0   :  { %p147_p5 = scmp.ne.s32.totalorder %s225_s3, %s146_s28  ;;  %p150_p6 = scmp.lt.u32.totalorder %s146_s28, %s225_s3 }
  0xf2   :  { %p152_p7 = pnand %p150_p6, %p147_p5 }
  0xf4   :  { %155 = shalt.err (!%p152_p7)
}
  0xf5   :  { %s161_s6 = smov 128   ;;  %s162_s7 = smov 8  }
  0xf6   :  { %111 = dma.vmem_to_hbm [thread:$0]  %s106_s25, 256, %s225_s3, [#allocation4], %s161_s6, %s161_s6, %s162_s7  }
  0xf7   :  { %156 = dma.done.wait [#allocation4], 256  }
  0xf8   :  { %157 = vsyncadd [#allocation4], 4294967040 }
  0xf9   :  { %115 = vsyncpa [#allocation4], 1 }

</bundles_post_ra>
